<compile_context>
chip_gen: v6e
topology: v6e:2x2x1
jax: 0.10.0
libtpu: 0.0.40
codegen_flags: <defaults>
</compile_context>

<pallas_src>
import math
import functools
import numpy as np
import jax
import jax.numpy as jnp
from jax.experimental import pallas as pl
from jax.experimental.pallas import tpu as pltpu


# ---------------------------------------------------------------------------
# helpers
# ---------------------------------------------------------------------------
def _round_up(x, m):
    return (x + m - 1) // m * m


def _cdiv(a, b):
    return -(-a // b)


def _l2_normalize(x, eps=1e-12):
    n = jnp.sqrt(jnp.sum(x * x, axis=1, keepdims=True))
    return x / jnp.maximum(n, eps)


def _fold_bn(gamma, beta, mean, var, eps=1e-5):
    scale = gamma / jnp.sqrt(var + eps)
    return scale, beta - mean * scale


# ---------------------------------------------------------------------------
# Stage 1: bn0 -> conv -> (bn1 folded) -> relu -> fc -> bn2 -> relu
# Produces the hidden activation x (B_pad, H_pad) in bf16, once per predict.
# ---------------------------------------------------------------------------
def conve_feature_kernel(e1_ref, rel_ref,            # VMEM (Bp, Hp) f32
                         convw_ref, convb_ref,       # SMEM (C*6,), (C,)  bn1-folded
                         scale0_ref, shift0_ref,     # SMEM (2,)          bn0 folded
                         fcw_ref, fcb_ref,           # VMEM (C*Hp, Hp), (1, Hp)
                         scale2_ref, shift2_ref,     # VMEM (1, Hp)       bn2 folded
                         x_ref,                      # VMEM (Bp, Hp) bf16 output
                         *, true_h, channels, apply_bn2):
    Bp, Hp = e1_ref.shape
    f32 = jnp.float32

    # bn0 (eval mode, folded); inp_drop is identity in eval mode.
    x0 = e1_ref[...] * scale0_ref[0] + shift0_ref[0]
    x1 = rel_ref[...] * scale0_ref[1] + shift0_ref[1]

    # k=3 / pad=1 conv taps along the lane (h_dim) axis via XLU rolls.
    # Boundary zeros are enforced at the *true* H edge; any leakage into padded
    # lanes is harmless because the corresponding fc-weight rows are zero.
    lane = jax.lax.broadcasted_iota(jnp.int32, (Bp, Hp), 1)

    def shift_prev(x):                     # y[:, h] = x[:, h-1], 0 at h == 0
        return jnp.where(lane == 0, 0.0, pltpu.roll(x, shift=1, axis=1))

    def shift_next(x):                     # y[:, h] = x[:, h+1], 0 at h == true_h-1
        return jnp.where(lane == true_h - 1, 0.0,
                         pltpu.roll(x, shift=Hp - 1, axis=1))

    taps = (shift_prev(x0), x0, shift_next(x0),
            shift_prev(x1), x1, shift_next(x1))

    # conv1 (+ bn1 folded into weights/bias) + relu; feature_map_drop identity.
    ys = []
    for c in range(channels):              # static unroll, C is small
        y = jnp.zeros((Bp, Hp), f32)
        for t in range(6):                 # tap index t = i*3 + k
            y = y + convw_ref[c * 6 + t] * taps[t]
        y = y + convb_ref[c]
        ys.append(jnp.maximum(y, 0.0))

    # fc as ONE (Bp, C*Hp) x (C*Hp, Hp) MXU matmul; channel-major concat along
    # the lane axis matches PyTorch's x.view(B, C*H).
    y_cat = jnp.concatenate(ys, axis=1)
    x = jnp.dot(y_cat, fcw_ref[...], preferred_element_type=f32) + fcb_ref[...]
    # hidden_drop is identity in eval mode
    if apply_bn2:                          # trace-time: batch_size > 1
        x = x * scale2_ref[...] + shift2_ref[...]
    x_ref[...] = jnp.maximum(x, 0.0).astype(x_ref.dtype)


# ---------------------------------------------------------------------------
# Stage 2: scores = relu(x @ tanh(eEmbeds).T) + 1e-5, streamed over the cached
# bf16 entity table in large lane-dense tiles.  Grid axis is "parallel".
# ---------------------------------------------------------------------------
def conve_score_kernel(x_ref, et_ref, out_ref):
    # x is already bf16 (no per-step cast); contraction on the MXU, f32 accum.
    s = jax.lax.dot_general(x_ref[...], et_ref[...],
                            dimension_numbers=(((1,), (1,)), ((), ())),
                            preferred_element_type=jnp.float32)
    out_ref[...] = jnp.maximum(s, 0.0) + 1e-5


# ---------------------------------------------------------------------------
# One-time setup + jitted predict.
# ---------------------------------------------------------------------------
def make_conve_predict(params, *, entity_tile=8192):
    """Hoists all constant preprocessing out of the per-predict path and
    returns a jitted predict(facts) -> (B, num_e) scores callable."""
    f32 = jnp.float32
    num_e, H = params["eEmbeds"].shape
    C = params["conv_w"].shape[0]
    H_pad = _round_up(H, 128)

    # ---- constant weight preprocessing (done once) ----
    scale0, shift0 = _fold_bn(*params["bn0"])
    scale1, shift1 = _fold_bn(*params["bn1"])
    scale2, shift2 = _fold_bn(*params["bn2"])

    # Fold bn1 into the conv weights/bias (exact in eval mode).
    convw_f = (params["conv_w"] * scale1[:, None, None]).reshape(-1)   # (C*6,)
    convb_f = params["conv_b"] * scale1 + shift1                       # (C,)

    # fc weight -> (C, H_in, H_out), zero-padded, flattened to (C*H_pad, H_pad):
    # (B, C*H_pad) @ W reproduces x.view(B, C*H) @ fc_w.T; padded rows are zero
    # so padded-lane garbage from the conv never leaks into the result.
    fcw_r = params["fc_w"].reshape(H, C, H).transpose(1, 2, 0)
    fcw_cat = (jnp.zeros((C, H_pad, H_pad), f32).at[:, :H, :H].set(fcw_r)
               .reshape(C * H_pad, H_pad))
    fcb_p = jnp.zeros((1, H_pad), f32).at[:, :H].set(params["fc_b"])
    scale2_p = jnp.zeros((1, H_pad), f32).at[:, :H].set(scale2)
    shift2_p = jnp.zeros((1, H_pad), f32).at[:, :H].set(shift2)

    # ---- entity-table preprocessing cached once (l2norm -> tanh -> pad -> bf16).
    # Removes the per-call full-table normalize/tanh/pad/cast passes; predict
    # only streams the cached bf16 table (half the HBM bytes of f32).
    eT_full = jnp.tanh(_l2_normalize(params["eEmbeds"]))               # (num_e, H)

    # ---- entity tile choice: large lane-contiguous tiles, VMEM-capped,
    # >=2 grid steps (when the table allows) so the "parallel" axis can shard
    # across both TensorCores on v7x (32 MiB scoped VMEM there).
    ne128 = _round_up(num_e, 128)
    vmem_budget = 24 * 1024 * 1024
    per_row_bytes = 2 * (2 * H_pad) + 2 * (4 * 128)   # et dbl-buf (bf16) + out dbl-buf (f32, B_pad<=128)
    tn_cap = max(128, (vmem_budget // per_row_bytes) // 128 * 128)
    tile = max(128, min(entity_tile, tn_cap, ne128))
    n_tiles = _cdiv(ne128, tile)
    if n_tiles == 1 and ne128 > 128:
        n_tiles = 2
    TN = _round_up(_cdiv(ne128, n_tiles), 128)
    num_e_pad = TN * n_tiles

    et_bf16 = (jnp.zeros((num_e_pad, H_pad), f32).at[:num_e, :H].set(eT_full)
               .astype(jnp.bfloat16))

    vmem = pl.BlockSpec(memory_space=pltpu.MemorySpace.VMEM)
    smem = pl.BlockSpec(memory_space=pltpu.MemorySpace.SMEM)

    @jax.jit
    def _predict(facts, eEmbeds_raw, rEmbeds_raw,
                 convw_f, convb_f, scale0, shift0,
                 fcw_cat, fcb_p, scale2_p, shift2_p, et_bf16):
        B = facts.shape[0]
        B_pad = max(_round_up(B, 16), 16)   # multiple of 16 for bf16 sublane packing

        # B-row gathers only; l2-normalize / tanh just those rows (row-wise op,
        # so gather-then-normalize == normalize-then-gather).
        e1 = jnp.tanh(_l2_normalize(eEmbeds_raw[facts[:, 0]]))          # (B, H)
        rel = _l2_normalize(rEmbeds_raw[facts[:, 1]])                   # (B, H)
        e1_p = jnp.zeros((B_pad, H_pad), f32).at[:B, :H].set(e1)
        rel_p = jnp.zeros((B_pad, H_pad), f32).at[:B, :H].set(rel)

        # Stage 1: hidden activation x (bf16), computed once per call.
        x_hidden = pl.pallas_call(
            functools.partial(conve_feature_kernel, true_h=H, channels=C,
                              apply_bn2=(B > 1)),
            out_shape=jax.ShapeDtypeStruct((B_pad, H_pad), jnp.bfloat16),
            in_specs=[vmem, vmem, smem, smem, smem, smem, vmem, vmem, vmem, vmem],
            out_specs=vmem,
        )(e1_p, rel_p, convw_f, convb_f, scale0, shift0,
          fcw_cat, fcb_p, scale2_p, shift2_p)

        # Stage 2: gridded, double-buffered scoring matmul over entity tiles.
        scores = pl.pallas_call(
            conve_score_kernel,
            out_shape=jax.ShapeDtypeStruct((B_pad, num_e_pad), jnp.float32),
            grid_spec=pltpu.PrefetchScalarGridSpec(
                num_scalar_prefetch=0,
                grid=(n_tiles,),
                in_specs=[pl.BlockSpec((B_pad, H_pad), lambda j: (0, 0)),
                          pl.BlockSpec((TN, H_pad), lambda j: (j, 0))],
                out_specs=pl.BlockSpec((B_pad, TN), lambda j: (0, j))),
            compiler_params=pltpu.CompilerParams(
                dimension_semantics=("parallel",),
                vmem_limit_bytes=32 << 20),
        )(x_hidden, et_bf16)

        return scores[:B, :num_e]

    def predict(facts):
        return _predict(facts, params["eEmbeds"], params["rEmbeds"],
                        convw_f, convb_f, scale0, shift0,
                        fcw_cat, fcb_p, scale2_p, shift2_p, et_bf16)

    return predict


def conve_predict_pallas(facts, params, *, entity_tile=8192):
    """Convenience one-shot wrapper (prep is cached inside make_conve_predict)."""
    return make_conve_predict(params, entity_tile=entity_tile)(facts)


# ---------------------------------------------------------------------------
# Pure-JAX f32 reference mirroring the PyTorch semantics (eval mode).
# ---------------------------------------------------------------------------
def conve_predict_ref(facts, params):
    eps = 1e-5
    eE = _l2_normalize(params["eEmbeds"])
    rE = _l2_normalize(params["rEmbeds"])
    eT = jnp.tanh(eE)
    B = facts.shape[0]
    H = eT.shape[1]
    e1 = eT[facts[:, 0]][:, None, :]
    r = rE[facts[:, 1]][:, None, :]
    x = jnp.concatenate([e1, r], axis=1)                            # (B, 2, H)
    g0, b0, m0, v0 = params["bn0"]
    x = (x - m0[None, :, None]) / jnp.sqrt(v0[None, :, None] + eps) \
        * g0[None, :, None] + b0[None, :, None]
    xp = jnp.pad(x, ((0, 0), (0, 0), (1, 1)))
    cols = jnp.stack([xp[:, :, k:k + H] for k in range(3)], axis=-1)  # (B,2,H,3)
    y = jnp.einsum("bihk,cik->bch", cols, params["conv_w"]) \
        + params["conv_b"][None, :, None]
    g1, b1, m1, v1 = params["bn1"]
    y = (y - m1[None, :, None]) / jnp.sqrt(v1[None, :, None] + eps) \
        * g1[None, :, None] + b1[None, :, None]
    y = jnp.maximum(y, 0.0)
    y = y.reshape(B, -1)                                            # (B, C*H)
    z = y @ params["fc_w"].T + params["fc_b"]
    if B > 1:
        g2, b2, m2, v2 = params["bn2"]
        z = (z - m2) / jnp.sqrt(v2 + eps) * g2 + b2
    z = jnp.maximum(z, 0.0)
    s = z @ eT.T
    return jnp.maximum(s, 0.0) + 1e-5


if __name__ == "__main__":
    num_e, num_r, h_dim, channels, ksize = 64, 4, 32, 8, 3
    B = 4

    key = jax.random.PRNGKey(0)
    ks = jax.random.split(key, 8)

    def xavier_normal(k, shape):
        std = math.sqrt(2.0 / (shape[0] + shape[1]))
        return (std * jax.random.normal(k, shape)).astype(jnp.float32)

    params = {
        "eEmbeds": xavier_normal(ks[0], (num_e, h_dim)),
        "rEmbeds": xavier_normal(ks[1], (num_r * 2, h_dim)),
        "conv_w": (0.1 * jax.random.normal(ks[2], (channels, 2, ksize))).astype(jnp.float32),
        "conv_b": (0.05 * jax.random.normal(ks[3], (channels,))).astype(jnp.float32),
        "fc_w": (0.05 * jax.random.normal(ks[4], (h_dim, h_dim * channels))).astype(jnp.float32),
        "fc_b": (0.05 * jax.random.normal(ks[5], (h_dim,))).astype(jnp.float32),
        # BatchNorm params (gamma, beta, running_mean, running_var) at fresh init
        "bn0": (jnp.ones((2,), jnp.float32), jnp.zeros((2,), jnp.float32),
                jnp.zeros((2,), jnp.float32), jnp.ones((2,), jnp.float32)),
        "bn1": (jnp.ones((channels,), jnp.float32), jnp.zeros((channels,), jnp.float32),
                jnp.zeros((channels,), jnp.float32), jnp.ones((channels,), jnp.float32)),
        "bn2": (jnp.ones((h_dim,), jnp.float32), jnp.zeros((h_dim,), jnp.float32),
                jnp.zeros((h_dim,), jnp.float32), jnp.ones((h_dim,), jnp.float32)),
    }
    # TODO(synk): training-mode dropout / batch-statistics BatchNorm not implemented
    # (kernel reproduces eval-mode semantics).
    # TODO(synk): optional int8 (v5e/v6e) / fp8 (v7x) entity-table streaming not
    # enabled by default; bf16 kept for score accuracy.

    facts = jnp.stack([
        jax.random.randint(ks[6], (B,), 0, num_e),
        jax.random.randint(ks[7], (B,), 0, num_r * 2),
        jax.random.randint(ks[6], (B,), 0, num_e),
    ], axis=1).astype(jnp.int32)

    predict = make_conve_predict(params)          # one-time prep (cached bf16 table)
    out = jax.block_until_ready(predict(facts))
    ref = jax.block_until_ready(conve_predict_ref(facts, params))
    # Tolerance accounts for bf16 hidden activation / bf16 entity-table streaming
    # on the MXU scoring matmul (reference is pure f32).
    np.testing.assert_allclose(np.asarray(out), np.asarray(ref),
                               rtol=2e-2, atol=5e-3)
    print("KERNEL_OK")
</pallas_src>

<mosaic_0001>
module attributes {stable_mosaic.version = 11 : i64} {
  func.func @conve_score_kernel(%arg0: i32, %arg1: memref<16x128xbf16, #tpu.memory_space<vmem>>, %arg2: memref<128x128xbf16, #tpu.memory_space<vmem>>, %arg3: memref<16x128xf32, #tpu.memory_space<vmem>>) attributes {dimension_semantics = [#tpu.dimension_semantics<parallel>], iteration_bounds = array<i64: 1>, scalar_prefetch = 0 : i64, scratch_operands = 0 : i64, tpu.core_type = #tpu.core_type<tc>, window_params = [{pipeline_mode = #tpu.pipeline_mode<synchronous>, transform_indices = @transform_0, window_bounds = array<i64: 16, 128>}, {transform_indices = @transform_1, window_bounds = array<i64: 128, 128>}, {transform_indices = @transform_2, window_bounds = array<i64: 16, 128>}]} {
    %c0 = arith.constant 0 : index
    %c0_0 = arith.constant 0 : index
    %0 = vector.load %arg1[%c0, %c0_0] : memref<16x128xbf16, #tpu.memory_space<vmem>>, vector<16x128xbf16>
    %c0_1 = arith.constant 0 : index
    %c0_2 = arith.constant 0 : index
    %1 = vector.load %arg2[%c0_1, %c0_2] : memref<128x128xbf16, #tpu.memory_space<vmem>>, vector<128x128xbf16>
    %cst = arith.constant dense<0.000000e+00> : vector<16x128xf32>
    %2 = tpu.matmul %0, %1, %cst {dimension_numbers = #tpu.dot_dimension_numbers<[1], [1], [0], [0], [0, 0, 1, 0], [], []>} : vector<16x128xbf16>, vector<128x128xbf16>, vector<16x128xf32> -> vector<16x128xf32>
    %cst_3 = arith.constant 0.000000e+00 : f32
    %3 = vector.broadcast %cst_3 : f32 to vector<16x128xf32>
    %4 = arith.maximumf %2, %3 : vector<16x128xf32>
    %cst_4 = arith.constant 9.99999974E-6 : f32
    %5 = vector.broadcast %cst_4 : f32 to vector<16x128xf32>
    %6 = arith.addf %4, %5 : vector<16x128xf32>
    %c0_5 = arith.constant 0 : index
    %c0_6 = arith.constant 0 : index
    %7 = vector.load %arg3[%c0_5, %c0_6] : memref<16x128xf32, #tpu.memory_space<vmem>>, vector<16x128xf32>
    tpu.vector_store %arg3[%c0_5, %c0_6], %6 {strides = array<i32>} : memref<16x128xf32, #tpu.memory_space<vmem>>, vector<16x128xf32>,
    return
  }
  func.func @transform_0(%arg0: i32) -> (i32, i32) {
    %c0_i32 = arith.constant 0 : i32
    %c0_i32_0 = arith.constant 0 : i32
    %c0_i32_1 = arith.constant 0 : i32
    return %c0_i32, %c0_i32_0 : i32, i32
  }
  func.func @transform_1(%arg0: i32) -> (i32, i32) {
    %c0_i32 = arith.constant 0 : i32
    %c0_i32_0 = arith.constant 0 : i32
    return %arg0, %c0_i32 : i32, i32
  }
  func.func @transform_2(%arg0: i32) -> (i32, i32) {
    %c0_i32 = arith.constant 0 : i32
    %c0_i32_0 = arith.constant 0 : i32
    return %c0_i32, %arg0 : i32, i32
  }
}

module attributes {stable_mosaic.version = 11 : i64} {
  func.func @conve_feature_kernel(%arg0: memref<16x128xf32, #tpu.memory_space<vmem>>, %arg1: memref<16x128xf32, #tpu.memory_space<vmem>>, %arg2: memref<48xf32, #tpu.memory_space<smem>>, %arg3: memref<8xf32, #tpu.memory_space<smem>>, %arg4: memref<2xf32, #tpu.memory_space<smem>>, %arg5: memref<2xf32, #tpu.memory_space<smem>>, %arg6: memref<1024x128xf32, #tpu.memory_space<vmem>>, %arg7: memref<1x128xf32, #tpu.memory_space<vmem>>, %arg8: memref<1x128xf32, #tpu.memory_space<vmem>>, %arg9: memref<1x128xf32, #tpu.memory_space<vmem>>, %arg10: memref<16x128xbf16, #tpu.memory_space<vmem>>) attributes {dimension_semantics = [], scalar_prefetch = 0 : i64, scratch_operands = 0 : i64, tpu.core_type = #tpu.core_type<tc>} {
    %c0 = arith.constant 0 : index
    %c0_0 = arith.constant 0 : index
    %0 = vector.load %arg0[%c0, %c0_0] : memref<16x128xf32, #tpu.memory_space<vmem>>, vector<16x128xf32>
    %c0_1 = arith.constant 0 : index
    %1 = memref.load %arg4[%c0_1] : memref<2xf32, #tpu.memory_space<smem>>
    %2 = vector.broadcast %1 : f32 to vector<16x128xf32>
    %3 = arith.mulf %0, %2 : vector<16x128xf32>
    %c0_2 = arith.constant 0 : index
    %4 = memref.load %arg5[%c0_2] : memref<2xf32, #tpu.memory_space<smem>>
    %5 = vector.broadcast %4 : f32 to vector<16x128xf32>
    %6 = arith.addf %3, %5 : vector<16x128xf32>
    %c0_3 = arith.constant 0 : index
    %c0_4 = arith.constant 0 : index
    %7 = vector.load %arg1[%c0_3, %c0_4] : memref<16x128xf32, #tpu.memory_space<vmem>>, vector<16x128xf32>
    %c1 = arith.constant 1 : index
    %8 = memref.load %arg4[%c1] : memref<2xf32, #tpu.memory_space<smem>>
    %9 = vector.broadcast %8 : f32 to vector<16x128xf32>
    %10 = arith.mulf %7, %9 : vector<16x128xf32>
    %c1_5 = arith.constant 1 : index
    %11 = memref.load %arg5[%c1_5] : memref<2xf32, #tpu.memory_space<smem>>
    %12 = vector.broadcast %11 : f32 to vector<16x128xf32>
    %13 = arith.addf %10, %12 : vector<16x128xf32>
    %14 = tpu.iota {dimensions = array<i32: 1>} : vector<16x128xi32>
    %c0_i32 = arith.constant 0 : i32
    %15 = vector.broadcast %c0_i32 : i32 to vector<16x128xi32>
    %16 = arith.cmpi eq, %14, %15 : vector<16x128xi32>
    %c1_i32 = arith.constant 1 : i32
    %17 = tpu.dynamic_rotate %6 by %c1_i32 dim 1 : vector<16x128xf32>, i32 -> vector<16x128xf32>
    %cst = arith.constant 0.000000e+00 : f32
    %18 = vector.broadcast %cst : f32 to vector<16x128xf32>
    %19 = arith.select %16, %18, %17 : vector<16x128xi1>, vector<16x128xf32>
    %c31_i32 = arith.constant 31 : i32
    %20 = vector.broadcast %c31_i32 : i32 to vector<16x128xi32>
    %21 = arith.cmpi eq, %14, %20 : vector<16x128xi32>
    %c127_i32 = arith.constant 127 : i32
    %22 = tpu.dynamic_rotate %6 by %c127_i32 dim 1 : vector<16x128xf32>, i32 -> vector<16x128xf32>
    %cst_6 = arith.constant 0.000000e+00 : f32
    %23 = vector.broadcast %cst_6 : f32 to vector<16x128xf32>
    %24 = arith.select %21, %23, %22 : vector<16x128xi1>, vector<16x128xf32>
    %c0_i32_7 = arith.constant 0 : i32
    %25 = vector.broadcast %c0_i32_7 : i32 to vector<16x128xi32>
    %26 = arith.cmpi eq, %14, %25 : vector<16x128xi32>
    %c1_i32_8 = arith.constant 1 : i32
    %27 = tpu.dynamic_rotate %13 by %c1_i32_8 dim 1 : vector<16x128xf32>, i32 -> vector<16x128xf32>
    %cst_9 = arith.constant 0.000000e+00 : f32
    %28 = vector.broadcast %cst_9 : f32 to vector<16x128xf32>
    %29 = arith.select %26, %28, %27 : vector<16x128xi1>, vector<16x128xf32>
    %c31_i32_10 = arith.constant 31 : i32
    %30 = vector.broadcast %c31_i32_10 : i32 to vector<16x128xi32>
    %31 = arith.cmpi eq, %14, %30 : vector<16x128xi32>
    %c127_i32_11 = arith.constant 127 : i32
    %32 = tpu.dynamic_rotate %13 by %c127_i32_11 dim 1 : vector<16x128xf32>, i32 -> vector<16x128xf32>
    %cst_12 = arith.constant 0.000000e+00 : f32
    %33 = vector.broadcast %cst_12 : f32 to vector<16x128xf32>
    %34 = arith.select %31, %33, %32 : vector<16x128xi1>, vector<16x128xf32>
    %cst_13 = arith.constant 0.000000e+00 : f32
    %35 = vector.broadcast %cst_13 : f32 to vector<16x128xf32>
    %c0_14 = arith.constant 0 : index
    %36 = memref.load %arg2[%c0_14] : memref<48xf32, #tpu.memory_space<smem>>
    %37 = vector.broadcast %36 : f32 to vector<16x128xf32>
    %38 = arith.mulf %37, %19 : vector<16x128xf32>
    %39 = arith.addf %35, %38 : vector<16x128xf32>
    %c1_15 = arith.constant 1 : index
    %40 = memref.load %arg2[%c1_15] : memref<48xf32, #tpu.memory_space<smem>>
    %41 = vector.broadcast %40 : f32 to vector<16x128xf32>
    %42 = arith.mulf %41, %6 : vector<16x128xf32>
    %43 = arith.addf %39, %42 : vector<16x128xf32>
    %c2 = arith.constant 2 : index
    %44 = memref.load %arg2[%c2] : memref<48xf32, #tpu.memory_space<smem>>
    %45 = vector.broadcast %44 : f32 to vector<16x128xf32>
    %46 = arith.mulf %45, %24 : vector<16x128xf32>
    %47 = arith.addf %43, %46 : vector<16x128xf32>
    %c3 = arith.constant 3 : index
    %48 = memref.load %arg2[%c3] : memref<48xf32, #tpu.memory_space<smem>>
    %49 = vector.broadcast %48 : f32 to vector<16x128xf32>
    %50 = arith.mulf %49, %29 : vector<16x128xf32>
    %51 = arith.addf %47, %50 : vector<16x128xf32>
    %c4 = arith.constant 4 : index
    %52 = memref.load %arg2[%c4] : memref<48xf32, #tpu.memory_space<smem>>
    %53 = vector.broadcast %52 : f32 to vector<16x128xf32>
    %54 = arith.mulf %53, %13 : vector<16x128xf32>
    %55 = arith.addf %51, %54 : vector<16x128xf32>
    %c5 = arith.constant 5 : index
    %56 = memref.load %arg2[%c5] : memref<48xf32, #tpu.memory_space<smem>>
    %57 = vector.broadcast %56 : f32 to vector<16x128xf32>
    %58 = arith.mulf %57, %34 : vector<16x128xf32>
    %59 = arith.addf %55, %58 : vector<16x128xf32>
    %c0_16 = arith.constant 0 : index
    %60 = memref.load %arg3[%c0_16] : memref<8xf32, #tpu.memory_space<smem>>
    %61 = vector.broadcast %60 : f32 to vector<16x128xf32>
    %62 = arith.addf %59, %61 : vector<16x128xf32>
    %cst_17 = arith.constant 0.000000e+00 : f32
    %63 = vector.broadcast %cst_17 : f32 to vector<16x128xf32>
    %64 = arith.maximumf %62, %63 : vector<16x128xf32>
    %cst_18 = arith.constant 0.000000e+00 : f32
    %65 = vector.broadcast %cst_18 : f32 to vector<16x128xf32>
    %c6 = arith.constant 6 : index
    %66 = memref.load %arg2[%c6] : memref<48xf32, #tpu.memory_space<smem>>
    %67 = vector.broadcast %66 : f32 to vector<16x128xf32>
    %68 = arith.mulf %67, %19 : vector<16x128xf32>
    %69 = arith.addf %65, %68 : vector<16x128xf32>
    %c7 = arith.constant 7 : index
    %70 = memref.load %arg2[%c7] : memref<48xf32, #tpu.memory_space<smem>>
    %71 = vector.broadcast %70 : f32 to vector<16x128xf32>
    %72 = arith.mulf %71, %6 : vector<16x128xf32>
    %73 = arith.addf %69, %72 : vector<16x128xf32>
    %c8 = arith.constant 8 : index
    %74 = memref.load %arg2[%c8] : memref<48xf32, #tpu.memory_space<smem>>
    %75 = vector.broadcast %74 : f32 to vector<16x128xf32>
    %76 = arith.mulf %75, %24 : vector<16x128xf32>
    %77 = arith.addf %73, %76 : vector<16x128xf32>
    %c9 = arith.constant 9 : index
    %78 = memref.load %arg2[%c9] : memref<48xf32, #tpu.memory_space<smem>>
    %79 = vector.broadcast %78 : f32 to vector<16x128xf32>
    %80 = arith.mulf %79, %29 : vector<16x128xf32>
    %81 = arith.addf %77, %80 : vector<16x128xf32>
    %c10 = arith.constant 10 : index
    %82 = memref.load %arg2[%c10] : memref<48xf32, #tpu.memory_space<smem>>
    %83 = vector.broadcast %82 : f32 to vector<16x128xf32>
    %84 = arith.mulf %83, %13 : vector<16x128xf32>
    %85 = arith.addf %81, %84 : vector<16x128xf32>
    %c11 = arith.constant 11 : index
    %86 = memref.load %arg2[%c11] : memref<48xf32, #tpu.memory_space<smem>>
    %87 = vector.broadcast %86 : f32 to vector<16x128xf32>
    %88 = arith.mulf %87, %34 : vector<16x128xf32>
    %89 = arith.addf %85, %88 : vector<16x128xf32>
    %c1_19 = arith.constant 1 : index
    %90 = memref.load %arg3[%c1_19] : memref<8xf32, #tpu.memory_space<smem>>
    %91 = vector.broadcast %90 : f32 to vector<16x128xf32>
    %92 = arith.addf %89, %91 : vector<16x128xf32>
    %cst_20 = arith.constant 0.000000e+00 : f32
    %93 = vector.broadcast %cst_20 : f32 to vector<16x128xf32>
    %94 = arith.maximumf %92, %93 : vector<16x128xf32>
    %cst_21 = arith.constant 0.000000e+00 : f32
    %95 = vector.broadcast %cst_21 : f32 to vector<16x128xf32>
    %c12 = arith.constant 12 : index
    %96 = memref.load %arg2[%c12] : memref<48xf32, #tpu.memory_space<smem>>
    %97 = vector.broadcast %96 : f32 to vector<16x128xf32>
    %98 = arith.mulf %97, %19 : vector<16x128xf32>
    %99 = arith.addf %95, %98 : vector<16x128xf32>
    %c13 = arith.constant 13 : index
    %100 = memref.load %arg2[%c13] : memref<48xf32, #tpu.memory_space<smem>>
    %101 = vector.broadcast %100 : f32 to vector<16x128xf32>
    %102 = arith.mulf %101, %6 : vector<16x128xf32>
    %103 = arith.addf %99, %102 : vector<16x128xf32>
    %c14 = arith.constant 14 : index
    %104 = memref.load %arg2[%c14] : memref<48xf32, #tpu.memory_space<smem>>
    %105 = vector.broadcast %104 : f32 to vector<16x128xf32>
    %106 = arith.mulf %105, %24 : vector<16x128xf32>
    %107 = arith.addf %103, %106 : vector<16x128xf32>
    %c15 = arith.constant 15 : index
    %108 = memref.load %arg2[%c15] : memref<48xf32, #tpu.memory_space<smem>>
    %109 = vector.broadcast %108 : f32 to vector<16x128xf32>
    %110 = arith.mulf %109, %29 : vector<16x128xf32>
    %111 = arith.addf %107, %110 : vector<16x128xf32>
    %c16 = arith.constant 16 : index
    %112 = memref.load %arg2[%c16] : memref<48xf32, #tpu.memory_space<smem>>
    %113 = vector.broadcast %112 : f32 to vector<16x128xf32>
    %114 = arith.mulf %113, %13 : vector<16x128xf32>
    %115 = arith.addf %111, %114 : vector<16x128xf32>
    %c17 = arith.constant 17 : index
    %116 = memref.load %arg2[%c17] : memref<48xf32, #tpu.memory_space<smem>>
    %117 = vector.broadcast %116 : f32 to vector<16x128xf32>
    %118 = arith.mulf %117, %34 : vector<16x128xf32>
    %119 = arith.addf %115, %118 : vector<16x128xf32>
    %c2_22 = arith.constant 2 : index
    %120 = memref.load %arg3[%c2_22] : memref<8xf32, #tpu.memory_space<smem>>
    %121 = vector.broadcast %120 : f32 to vector<16x128xf32>
    %122 = arith.addf %119, %121 : vector<16x128xf32>
    %cst_23 = arith.constant 0.000000e+00 : f32
    %123 = vector.broadcast %cst_23 : f32 to vector<16x128xf32>
    %124 = arith.maximumf %122, %123 : vector<16x128xf32>
    %cst_24 = arith.constant 0.000000e+00 : f32
    %125 = vector.broadcast %cst_24 : f32 to vector<16x128xf32>
    %c18 = arith.constant 18 : index
    %126 = memref.load %arg2[%c18] : memref<48xf32, #tpu.memory_space<smem>>
    %127 = vector.broadcast %126 : f32 to vector<16x128xf32>
    %128 = arith.mulf %127, %19 : vector<16x128xf32>
    %129 = arith.addf %125, %128 : vector<16x128xf32>
    %c19 = arith.constant 19 : index
    %130 = memref.load %arg2[%c19] : memref<48xf32, #tpu.memory_space<smem>>
    %131 = vector.broadcast %130 : f32 to vector<16x128xf32>
    %132 = arith.mulf %131, %6 : vector<16x128xf32>
    %133 = arith.addf %129, %132 : vector<16x128xf32>
    %c20 = arith.constant 20 : index
    %134 = memref.load %arg2[%c20] : memref<48xf32, #tpu.memory_space<smem>>
    %135 = vector.broadcast %134 : f32 to vector<16x128xf32>
    %136 = arith.mulf %135, %24 : vector<16x128xf32>
    %137 = arith.addf %133, %136 : vector<16x128xf32>
    %c21 = arith.constant 21 : index
    %138 = memref.load %arg2[%c21] : memref<48xf32, #tpu.memory_space<smem>>
    %139 = vector.broadcast %138 : f32 to vector<16x128xf32>
    %140 = arith.mulf %139, %29 : vector<16x128xf32>
    %141 = arith.addf %137, %140 : vector<16x128xf32>
    %c22 = arith.constant 22 : index
    %142 = memref.load %arg2[%c22] : memref<48xf32, #tpu.memory_space<smem>>
    %143 = vector.broadcast %142 : f32 to vector<16x128xf32>
    %144 = arith.mulf %143, %13 : vector<16x128xf32>
    %145 = arith.addf %141, %144 : vector<16x128xf32>
    %c23 = arith.constant 23 : index
    %146 = memref.load %arg2[%c23] : memref<48xf32, #tpu.memory_space<smem>>
    %147 = vector.broadcast %146 : f32 to vector<16x128xf32>
    %148 = arith.mulf %147, %34 : vector<16x128xf32>
    %149 = arith.addf %145, %148 : vector<16x128xf32>
    %c3_25 = arith.constant 3 : index
    %150 = memref.load %arg3[%c3_25] : memref<8xf32, #tpu.memory_space<smem>>
    %151 = vector.broadcast %150 : f32 to vector<16x128xf32>
    %152 = arith.addf %149, %151 : vector<16x128xf32>
    %cst_26 = arith.constant 0.000000e+00 : f32
    %153 = vector.broadcast %cst_26 : f32 to vector<16x128xf32>
    %154 = arith.maximumf %152, %153 : vector<16x128xf32>
    %cst_27 = arith.constant 0.000000e+00 : f32
    %155 = vector.broadcast %cst_27 : f32 to vector<16x128xf32>
    %c24 = arith.constant 24 : index
    %156 = memref.load %arg2[%c24] : memref<48xf32, #tpu.memory_space<smem>>
    %157 = vector.broadcast %156 : f32 to vector<16x128xf32>
    %158 = arith.mulf %157, %19 : vector<16x128xf32>
    %159 = arith.addf %155, %158 : vector<16x128xf32>
    %c25 = arith.constant 25 : index
    %160 = memref.load %arg2[%c25] : memref<48xf32, #tpu.memory_space<smem>>
    %161 = vector.broadcast %160 : f32 to vector<16x128xf32>
    %162 = arith.mulf %161, %6 : vector<16x128xf32>
    %163 = arith.addf %159, %162 : vector<16x128xf32>
    %c26 = arith.constant 26 : index
    %164 = memref.load %arg2[%c26] : memref<48xf32, #tpu.memory_space<smem>>
    %165 = vector.broadcast %164 : f32 to vector<16x128xf32>
    %166 = arith.mulf %165, %24 : vector<16x128xf32>
    %167 = arith.addf %163, %166 : vector<16x128xf32>
    %c27 = arith.constant 27 : index
    %168 = memref.load %arg2[%c27] : memref<48xf32, #tpu.memory_space<smem>>
    %169 = vector.broadcast %168 : f32 to vector<16x128xf32>
    %170 = arith.mulf %169, %29 : vector<16x128xf32>
    %171 = arith.addf %167, %170 : vector<16x128xf32>
    %c28 = arith.constant 28 : index
    %172 = memref.load %arg2[%c28] : memref<48xf32, #tpu.memory_space<smem>>
    %173 = vector.broadcast %172 : f32 to vector<16x128xf32>
    %174 = arith.mulf %173, %13 : vector<16x128xf32>
    %175 = arith.addf %171, %174 : vector<16x128xf32>
    %c29 = arith.constant 29 : index
    %176 = memref.load %arg2[%c29] : memref<48xf32, #tpu.memory_space<smem>>
    %177 = vector.broadcast %176 : f32 to vector<16x128xf32>
    %178 = arith.mulf %177, %34 : vector<16x128xf32>
    %179 = arith.addf %175, %178 : vector<16x128xf32>
    %c4_28 = arith.constant 4 : index
    %180 = memref.load %arg3[%c4_28] : memref<8xf32, #tpu.memory_space<smem>>
    %181 = vector.broadcast %180 : f32 to vector<16x128xf32>
    %182 = arith.addf %179, %181 : vector<16x128xf32>
    %cst_29 = arith.constant 0.000000e+00 : f32
    %183 = vector.broadcast %cst_29 : f32 to vector<16x128xf32>
    %184 = arith.maximumf %182, %183 : vector<16x128xf32>
    %cst_30 = arith.constant 0.000000e+00 : f32
    %185 = vector.broadcast %cst_30 : f32 to vector<16x128xf32>
    %c30 = arith.constant 30 : index
    %186 = memref.load %arg2[%c30] : memref<48xf32, #tpu.memory_space<smem>>
    %187 = vector.broadcast %186 : f32 to vector<16x128xf32>
    %188 = arith.mulf %187, %19 : vector<16x128xf32>
    %189 = arith.addf %185, %188 : vector<16x128xf32>
    %c31 = arith.constant 31 : index
    %190 = memref.load %arg2[%c31] : memref<48xf32, #tpu.memory_space<smem>>
    %191 = vector.broadcast %190 : f32 to vector<16x128xf32>
    %192 = arith.mulf %191, %6 : vector<16x128xf32>
    %193 = arith.addf %189, %192 : vector<16x128xf32>
    %c32 = arith.constant 32 : index
    %194 = memref.load %arg2[%c32] : memref<48xf32, #tpu.memory_space<smem>>
    %195 = vector.broadcast %194 : f32 to vector<16x128xf32>
    %196 = arith.mulf %195, %24 : vector<16x128xf32>
    %197 = arith.addf %193, %196 : vector<16x128xf32>
    %c33 = arith.constant 33 : index
    %198 = memref.load %arg2[%c33] : memref<48xf32, #tpu.memory_space<smem>>
    %199 = vector.broadcast %198 : f32 to vector<16x128xf32>
    %200 = arith.mulf %199, %29 : vector<16x128xf32>
    %201 = arith.addf %197, %200 : vector<16x128xf32>
    %c34 = arith.constant 34 : index
    %202 = memref.load %arg2[%c34] : memref<48xf32, #tpu.memory_space<smem>>
    %203 = vector.broadcast %202 : f32 to vector<16x128xf32>
    %204 = arith.mulf %203, %13 : vector<16x128xf32>
    %205 = arith.addf %201, %204 : vector<16x128xf32>
    %c35 = arith.constant 35 : index
    %206 = memref.load %arg2[%c35] : memref<48xf32, #tpu.memory_space<smem>>
    %207 = vector.broadcast %206 : f32 to vector<16x128xf32>
    %208 = arith.mulf %207, %34 : vector<16x128xf32>
    %209 = arith.addf %205, %208 : vector<16x128xf32>
    %c5_31 = arith.constant 5 : index
    %210 = memref.load %arg3[%c5_31] : memref<8xf32, #tpu.memory_space<smem>>
    %211 = vector.broadcast %210 : f32 to vector<16x128xf32>
    %212 = arith.addf %209, %211 : vector<16x128xf32>
    %cst_32 = arith.constant 0.000000e+00 : f32
    %213 = vector.broadcast %cst_32 : f32 to vector<16x128xf32>
    %214 = arith.maximumf %212, %213 : vector<16x128xf32>
    %cst_33 = arith.constant 0.000000e+00 : f32
    %215 = vector.broadcast %cst_33 : f32 to vector<16x128xf32>
    %c36 = arith.constant 36 : index
    %216 = memref.load %arg2[%c36] : memref<48xf32, #tpu.memory_space<smem>>
    %217 = vector.broadcast %216 : f32 to vector<16x128xf32>
    %218 = arith.mulf %217, %19 : vector<16x128xf32>
    %219 = arith.addf %215, %218 : vector<16x128xf32>
    %c37 = arith.constant 37 : index
    %220 = memref.load %arg2[%c37] : memref<48xf32, #tpu.memory_space<smem>>
    %221 = vector.broadcast %220 : f32 to vector<16x128xf32>
    %222 = arith.mulf %221, %6 : vector<16x128xf32>
    %223 = arith.addf %219, %222 : vector<16x128xf32>
    %c38 = arith.constant 38 : index
    %224 = memref.load %arg2[%c38] : memref<48xf32, #tpu.memory_space<smem>>
    %225 = vector.broadcast %224 : f32 to vector<16x128xf32>
    %226 = arith.mulf %225, %24 : vector<16x128xf32>
    %227 = arith.addf %223, %226 : vector<16x128xf32>
    %c39 = arith.constant 39 : index
    %228 = memref.load %arg2[%c39] : memref<48xf32, #tpu.memory_space<smem>>
    %229 = vector.broadcast %228 : f32 to vector<16x128xf32>
    %230 = arith.mulf %229, %29 : vector<16x128xf32>
    %231 = arith.addf %227, %230 : vector<16x128xf32>
    %c40 = arith.constant 40 : index
    %232 = memref.load %arg2[%c40] : memref<48xf32, #tpu.memory_space<smem>>
    %233 = vector.broadcast %232 : f32 to vector<16x128xf32>
    %234 = arith.mulf %233, %13 : vector<16x128xf32>
    %235 = arith.addf %231, %234 : vector<16x128xf32>
    %c41 = arith.constant 41 : index
    %236 = memref.load %arg2[%c41] : memref<48xf32, #tpu.memory_space<smem>>
    %237 = vector.broadcast %236 : f32 to vector<16x128xf32>
    %238 = arith.mulf %237, %34 : vector<16x128xf32>
    %239 = arith.addf %235, %238 : vector<16x128xf32>
    %c6_34 = arith.constant 6 : index
    %240 = memref.load %arg3[%c6_34] : memref<8xf32, #tpu.memory_space<smem>>
    %241 = vector.broadcast %240 : f32 to vector<16x128xf32>
    %242 = arith.addf %239, %241 : vector<16x128xf32>
    %cst_35 = arith.constant 0.000000e+00 : f32
    %243 = vector.broadcast %cst_35 : f32 to vector<16x128xf32>
    %244 = arith.maximumf %242, %243 : vector<16x128xf32>
    %cst_36 = arith.constant 0.000000e+00 : f32
    %245 = vector.broadcast %cst_36 : f32 to vector<16x128xf32>
    %c42 = arith.constant 42 : index
    %246 = memref.load %arg2[%c42] : memref<48xf32, #tpu.memory_space<smem>>
    %247 = vector.broadcast %246 : f32 to vector<16x128xf32>
    %248 = arith.mulf %247, %19 : vector<16x128xf32>
    %249 = arith.addf %245, %248 : vector<16x128xf32>
    %c43 = arith.constant 43 : index
    %250 = memref.load %arg2[%c43] : memref<48xf32, #tpu.memory_space<smem>>
    %251 = vector.broadcast %250 : f32 to vector<16x128xf32>
    %252 = arith.mulf %251, %6 : vector<16x128xf32>
    %253 = arith.addf %249, %252 : vector<16x128xf32>
    %c44 = arith.constant 44 : index
    %254 = memref.load %arg2[%c44] : memref<48xf32, #tpu.memory_space<smem>>
    %255 = vector.broadcast %254 : f32 to vector<16x128xf32>
    %256 = arith.mulf %255, %24 : vector<16x128xf32>
    %257 = arith.addf %253, %256 : vector<16x128xf32>
    %c45 = arith.constant 45 : index
    %258 = memref.load %arg2[%c45] : memref<48xf32, #tpu.memory_space<smem>>
    %259 = vector.broadcast %258 : f32 to vector<16x128xf32>
    %260 = arith.mulf %259, %29 : vector<16x128xf32>
    %261 = arith.addf %257, %260 : vector<16x128xf32>
    %c46 = arith.constant 46 : index
    %262 = memref.load %arg2[%c46] : memref<48xf32, #tpu.memory_space<smem>>
    %263 = vector.broadcast %262 : f32 to vector<16x128xf32>
    %264 = arith.mulf %263, %13 : vector<16x128xf32>
    %265 = arith.addf %261, %264 : vector<16x128xf32>
    %c47 = arith.constant 47 : index
    %266 = memref.load %arg2[%c47] : memref<48xf32, #tpu.memory_space<smem>>
    %267 = vector.broadcast %266 : f32 to vector<16x128xf32>
    %268 = arith.mulf %267, %34 : vector<16x128xf32>
    %269 = arith.addf %265, %268 : vector<16x128xf32>
    %c7_37 = arith.constant 7 : index
    %270 = memref.load %arg3[%c7_37] : memref<8xf32, #tpu.memory_space<smem>>
    %271 = vector.broadcast %270 : f32 to vector<16x128xf32>
    %272 = arith.addf %269, %271 : vector<16x128xf32>
    %cst_38 = arith.constant 0.000000e+00 : f32
    %273 = vector.broadcast %cst_38 : f32 to vector<16x128xf32>
    %274 = arith.maximumf %272, %273 : vector<16x128xf32>
    %275 = tpu.concatenate %64, %94, %124, %154, %184, %214, %244, %274 in 1 : vector<16x128xf32>, vector<16x128xf32>, vector<16x128xf32>, vector<16x128xf32>, vector<16x128xf32>, vector<16x128xf32>, vector<16x128xf32>, vector<16x128xf32> -> vector<16x1024xf32>
    %c0_39 = arith.constant 0 : index
    %c0_40 = arith.constant 0 : index
    %276 = vector.load %arg6[%c0_39, %c0_40] : memref<1024x128xf32, #tpu.memory_space<vmem>>, vector<1024x128xf32>
    %cst_41 = arith.constant dense<0.000000e+00> : vector<16x128xf32>
    %277 = tpu.matmul %275, %276, %cst_41 {dimension_numbers = #tpu.dot_dimension_numbers<[1], [0], [0], [1], [0, 0, 1, 1], [], []>} : vector<16x1024xf32>, vector<1024x128xf32>, vector<16x128xf32> -> vector<16x128xf32>
    %c0_42 = arith.constant 0 : index
    %c0_43 = arith.constant 0 : index
    %278 = vector.load %arg7[%c0_42, %c0_43] : memref<1x128xf32, #tpu.memory_space<vmem>>, vector<1x128xf32>
    %279 = vector.broadcast %278 : vector<1x128xf32> to vector<16x128xf32>
    %280 = arith.addf %277, %279 : vector<16x128xf32>
    %c0_44 = arith.constant 0 : index
    %c0_45 = arith.constant 0 : index
    %281 = vector.load %arg8[%c0_44, %c0_45] : memref<1x128xf32, #tpu.memory_space<vmem>>, vector<1x128xf32>
    %282 = vector.broadcast %281 : vector<1x128xf32> to vector<16x128xf32>
    %283 = arith.mulf %280, %282 : vector<16x128xf32>
    %c0_46 = arith.constant 0 : index
    %c0_47 = arith.constant 0 : index
    %284 = vector.load %arg9[%c0_46, %c0_47] : memref<1x128xf32, #tpu.memory_space<vmem>>, vector<1x128xf32>
    %285 = vector.broadcast %284 : vector<1x128xf32> to vector<16x128xf32>
    %286 = arith.addf %283, %285 : vector<16x128xf32>
    %cst_48 = arith.constant 0.000000e+00 : f32
    %287 = vector.broadcast %cst_48 : f32 to vector<16x128xf32>
    %288 = arith.maximumf %286, %287 : vector<16x128xf32>
    %289 = arith.truncf %288 : vector<16x128xf32> to vector<16x128xbf16>
    %c0_49 = arith.constant 0 : index
    %c0_50 = arith.constant 0 : index
    %290 = vector.load %arg10[%c0_49, %c0_50] : memref<16x128xbf16, #tpu.memory_space<vmem>>, vector<16x128xbf16>
    tpu.vector_store %arg10[%c0_49, %c0_50], %289 {strides = array<i32>} : memref<16x128xbf16, #tpu.memory_space<vmem>>, vector<16x128xbf16>,
    return
  }
}

</mosaic_0001>

<bundles_post_ra>
// kernel: _predict.3
= control target key start
LH: loop header
LB: loop body
LE: loop exit
PB: predicated region body
PF: predicated region fallthrough
CT: control target
= control target key end

     0   :  { %v184_v0 = vmov 0.0   ;;  %vm185_vm0 = vmmov 0   ;;  %s234_s1 = inlined_call_operand.vmem [shape: bf16[128,128], index: 1, kind: input, shape index: {}]   ;;  %s235_s0 = inlined_call_operand.vmem [shape: bf16[16,128], index: 0, kind: input, shape index: {}]   ;;  %s236_s2 = inlined_call_operand.vmem [shape: f32[16,128], index: 2, kind: output, shape index: {}]  }
   0x1   :  { %153 = vmatprep.subr.bf16.mxu0 %v184_v0  ;;  %v175_v1 = vld [vmem:[%s234_s1 + $0x38] sm:$0xff]   ;;  %169 = vmatprep.mubr.msk.bf16.mxu0 %vm185_vm0, %v184_v0  ;;  %v176_v2 = vld [vmem:[%s234_s1 + $0x30] sm:$0xff]   ;;  %v177_v3 = vld [vmem:[%s234_s1 + $0x28] sm:$0xff]  }
   0x2   :  { %154 = vmatpush3.bf16.xpose.msra.mxu0 %v175_v1  ;;  %v178_v4 = vld [vmem:[%s234_s1 + $0x20] sm:$0xff]   ;;  %v179_v5 = vld [vmem:[%s234_s1 + $0x18] sm:$0xff]   ;;  %v180_v6 = vld [vmem:[%s234_s1 + $0x10] sm:$0xff]  }
   0x3   :  { %155 = vmatprep.subr.bf16.mxu0 %v184_v0  ;;  %v181_v7 = vld [vmem:[%s234_s1 + $0x8] sm:$0xff]   ;;  %v182_v8 = vld [vmem:[%s234_s1] sm:$0xff]  }
   0x4   :  { %v183_v9 = vld [vmem:[%s235_s0] sm:$0xff]  }
   0xa   :  { %156 = vmatpush3.bf16.xpose.msra.mxu0 %v176_v2 }
   0xb   :  { %157 = vmatprep.subr.bf16.mxu0 %v184_v0 }
  0x12   :  { %158 = vmatpush3.bf16.xpose.msra.mxu0 %v177_v3 }
  0x13   :  { %159 = vmatprep.subr.bf16.mxu0 %v184_v0 }
  0x1a   :  { %160 = vmatpush3.bf16.xpose.msra.mxu0 %v178_v4 }
  0x1b   :  { %161 = vmatprep.subr.bf16.mxu0 %v184_v0 }
  0x22   :  { %162 = vmatpush3.bf16.xpose.msra.mxu0 %v179_v5 }
  0x23   :  { %163 = vmatprep.subr.bf16.mxu0 %v184_v0 }
  0x2a   :  { %164 = vmatpush3.bf16.xpose.msra.mxu0 %v180_v6 }
  0x2b   :  { %165 = vmatprep.subr.bf16.mxu0 %v184_v0 }
  0x32   :  { %166 = vmatpush3.bf16.xpose.msra.mxu0 %v181_v7 }
  0x33   :  { %167 = vmatprep.subr.bf16.mxu0 %v184_v0 }
  0x3a   :  { %168 = vmatpush3.bf16.xpose.msra.mxu0 %v182_v8 }
  0x41   :  { %170 = vmatmul.mubr.bf16.vlgmr.msra.gmra.mxu0 %v183_v9 }
 0x101   :  { %v118_v10 = vpop.f32.mrf.mxu0 }
 0x102   :  { %v125_v11 = vmax.f32 %v118_v10, 0.0 }
 0x103   :  { %v171_v12 = vpop.f32.mrf.mxu0 }
 0x104   :  { %v127_v13 = vadd.f32 1e-05, %v125_v11 }
 0x105   :  { %v121_v14 = vpop.f32.mrf.mxu0 }
 0x106   :  { %129 = vst [vmem:[%s236_s2] sm:$0xff] %v127_v13  ;;  %v126_v15 = vmax.f32 %v121_v14, 0.0 }
 0x107   :  { %v172_v16 = vpop.f32.mrf.mxu0 }
 0x108   :  { %v128_v17 = vadd.f32 1e-05, %v126_v15 }
 0x10a   :  { %130 = vst [vmem:[%s236_s2 + $0x8] sm:$0xff] %v128_v17 }

// kernel: _predict.2
= control target key start
LH: loop header
LB: loop body
LE: loop exit
PB: predicated region body
PF: predicated region fallthrough
CT: control target
= control target key end

     0   :  { %s1973_s0 = inlined_call_operand.vmem [shape: f32[16,128], index: 0, kind: input, shape index: {}]   ;;  %s1974_s1 = inlined_call_operand.vmem [shape: f32[16,128], index: 1, kind: input, shape index: {}]   ;;  %s1975_s2 = inlined_call_operand.vmem [shape: f32[48], index: 2, kind: input, shape index: {}]   ;;  %s1976_s3 = inlined_call_operand.vmem [shape: f32[8], index: 3, kind: input, shape index: {}]   ;;  %s1977_s4 = inlined_call_operand.vmem [shape: f32[2], index: 4, kind: input, shape index: {}]   ;;  %s1978_s5 = inlined_call_operand.vmem [shape: f32[2], index: 5, kind: input, shape index: {}]   ;;  %s1979_s6 = inlined_call_operand.hbm [shape: f32[1024,128], index: 6, kind: input, shape index: {}]   ;;  %s1980_s7 = inlined_call_operand.vmem [shape: f32[1,128], index: 7, kind: input, shape index: {}]   ;;  %s1981_s8 = inlined_call_operand.vmem [shape: f32[1,128], index: 8, kind: input, shape index: {}]   ;;  %s1982_s9 = inlined_call_operand.vmem [shape: f32[1,128], index: 9, kind: input, shape index: {}]   ;;  %s1983_s10 = inlined_call_operand.vmem [shape: bf16[16,128], index: 10, kind: output, shape index: {}]  }
   0x1   :  { %2034 = sst [smem:[#allocation37_spill]] %s1980_s7 }
   0x2   :  { %2035 = sst [smem:[#allocation38_spill]] %s1981_s8 }
   0x3   :  { %2036 = sst [smem:[#allocation39_spill]] %s1982_s9 }
   0x4   :  { %2037 = sst [smem:[#allocation40_spill]] %s1983_s10 }
   0x5   :  { %15 = vsyncpa [#allocation4], 0 }
   0x6   :  { %16 = vsyncpa [#allocation6], 0 }
   0x7   :  { %17 = vsyncpa [#allocation9], 0  ;;  %s39_s15 = sshll.u32 %s1976_s3, 4  ;;  %s40_s15 = int_to_ptr.vmem [resolvable:$true] %s39_s15 }
   0x8   :  { %18 = vsyncpa [#allocation3], 0  ;;  %s29_s18 = sshll.u32 %s1975_s2, 4  ;;  %s1183_s19 = scalar_lea.vmem %s40_s15, 16  ;;  %s30_s18 = int_to_ptr.vmem [resolvable:$true] %s29_s18 }
   0x9   :  { %p1184_p0 = scmp.ne.s32.totalorder %s40_s15, %s1183_s19  ;;  %p1188_p1 = scmp.lt.s32.totalorder %s40_s15, %s40_s15 }
   0xa   :  { %p1189_p2 = scmp.lt.s32.totalorder %s1183_s19, %s1183_s19 }
   0xc   :  { %p1190_p3 = por %p1189_p2, %p1188_p1 }
   0xe   :  { %p1191_p4 = pnand %p1190_p3, %p1184_p0 }
  0x10   :  { %1194 = shalt.err (!%p1191_p4)
}
  0x11   :  { %s1259_s20 = smov [#allocation5]   ;;  %s1195_s21 = scalar_lea.vmem %s30_s18, 16 }
  0x12   :  { %42 = dma.vmem_to_smem %s40_s15, 16, %s1259_s20, [#allocation6]  }
  0x13   :  { %p1196_p5 = scmp.ne.s32.totalorder %s30_s18, %s1195_s21  ;;  %p1200_p6 = scmp.lt.s32.totalorder %s30_s18, %s30_s18 }
  0x14   :  { %p1201_p7 = scmp.lt.s32.totalorder %s1195_s21, %s1195_s21 }
  0x16   :  { %p1202_p8 = por %p1201_p7, %p1200_p6 }
  0x18   :  { %p1203_p9 = pnand %p1202_p8, %p1196_p5 }
  0x1a   :  { %1206 = shalt.err (!%p1203_p9)
}
  0x1b   :  { %s1260_s3 = smov [#allocation2]   ;;  %s49_s23 = sshll.u32 %s1977_s4, 4  ;;  %s50_s23 = int_to_ptr.vmem [resolvable:$true] %s49_s23 }
  0x1c   :  { %32 = dma.vmem_to_smem %s30_s18, 16, %s1260_s3, [#allocation4]  }
  0x1d   :  { %s59_s26 = sshll.u32 %s1978_s5, 4  ;;  %s1207_s27 = scalar_lea.vmem %s50_s23, 16  ;;  %s60_s26 = int_to_ptr.vmem [resolvable:$true] %s59_s26 }
  0x1e   :  { %p1208_p10 = scmp.ne.s32.totalorder %s50_s23, %s1207_s27  ;;  %p1212_p11 = scmp.lt.s32.totalorder %s50_s23, %s50_s23 }
  0x1f   :  { %p1213_p12 = scmp.lt.s32.totalorder %s1207_s27, %s1207_s27 }
  0x21   :  { %p1214_p13 = por %p1213_p12, %p1212_p11 }
  0x23   :  { %p1215_p0 = pnand %p1214_p13, %p1208_p10 }
  0x25   :  { %1218 = shalt.err (!%p1215_p0)
}
  0x26   :  { %s1261_s28 = smov [#allocation7]   ;;  %s1219_s29 = scalar_lea.vmem %s60_s26, 16 }
  0x27   :  { %52 = dma.vmem_to_smem %s50_s23, 16, %s1261_s28, [#allocation6]  }
  0x28   :  { %p1220_p1 = scmp.ne.s32.totalorder %s60_s26, %s1219_s29  ;;  %p1224_p2 = scmp.lt.s32.totalorder %s60_s26, %s60_s26 }
  0x29   :  { %p1225_p3 = scmp.lt.s32.totalorder %s1219_s29, %s1219_s29 }
  0x2b   :  { %p1226_p4 = por %p1225_p3, %p1224_p2 }
  0x2d   :  { %p1227_p5 = pnand %p1226_p4, %p1220_p1 }
  0x2f   :  { %1230 = shalt.err (!%p1227_p5)
}
  0x30   :  { %s1262_s4 = smov [#allocation8]   ;;  %s1263_s5 = smov [#allocation10]  }
  0x31   :  { %62 = dma.vmem_to_smem %s60_s26, 16, %s1262_s4, [#allocation9]  }
  0x32   :  { %s68_s30 = sshll.u32 %s1263_s5, 4  ;;  %s69_s30 = int_to_ptr.vmem [resolvable:$true] %s68_s30 }
  0x33   :  { %s1239_s11 = scalar_lea.vmem %s69_s30, 16384  ;;  %p1244_p7 = scmp.lt.s32.totalorder %s69_s30, %s69_s30 }
  0x34   :  { %p1240_p6 = scmp.ne.s32.totalorder %s69_s30, %s1239_s11  ;;  %p1245_p8 = scmp.lt.s32.totalorder %s1239_s11, %s1239_s11 }
  0x36   :  { %p1246_p9 = por %p1245_p8, %p1244_p7 }
  0x38   :  { %p1247_p10 = pnand %p1246_p9, %p1240_p6 }
  0x3a   :  { %1250 = shalt.err (!%p1247_p10)
}
  0x3b   :  { %s1264_s12 = smov 128   ;;  %s1265_s13 = smov 8  }
  0x3c   :  { %74 = dma.hbm_to_vmem [thread:$0]  %s1979_s6, 16384, %s69_s30, [#allocation3], %s1264_s12, %s1264_s12, %s1265_s13  }
  0x3d   :  { %1251 = dma.done.wait [#allocation4], 16  }
  0x3e   :  { %1252 = vsyncadd [#allocation4], 4294967280 }
  0x3f   :  { %1253 = dma.done.wait [#allocation6], 32  }
  0x40   :  { %1254 = vsyncadd [#allocation6], 4294967264 }
  0x41   :  { %1255 = dma.done.wait [#allocation9], 16  }
  0x42   :  { %1256 = vsyncadd [#allocation9], 4294967280 }
  0x43   :  { %1257 = dma.done.wait [#allocation3], 16384  }
  0x44   :  { %1258 = vsyncadd [#allocation3], 4294950912 }
  0x45   :  { %96 = sfence }
  0x46   :  { %s1338_s16 = sld [smem:[#allocation7]]  ;;  %v512_v0 = vld [vmem:[#allocation10 + $0xf8] sm:$0xff]  ;;  %v97_v2 = vld [vmem:[%s1973_s0] sm:$0xff]  ;;  %v511_v5 = vld [vmem:[#allocation10 + $0xf0] sm:$0xff]  ;;  %s1266_s23 = smov 1  }
  0x47   :  { %s1340_s17 = sld [smem:[#allocation8]]  ;;  %v544_v1 = vld [vmem:[#allocation10 + $0x1f8] sm:$0xff]  ;;  %1022 = vmatprep.subr.mxu0 %v512_v0  ;;  %v543_v6 = vld [vmem:[#allocation10 + $0x1f0] sm:$0xff]  ;;  %v510_v9 = vld [vmem:[#allocation10 + $0xe8] sm:$0xff]  ;;  %s1267_s25 = smov 127  }
  0x48   :  { %s1345_s6 = sld [smem:[#allocation7 + $0x1]]  ;;  %1060 = vmatprep.subr.mxu1 %v544_v1  ;;  %v496_v3 = vld [vmem:[#allocation10 + $0x78] sm:$0xff]  ;;  %v495_v7 = vld [vmem:[#allocation10 + $0x70] sm:$0xff]  ;;  %v542_v10 = vld [vmem:[#allocation10 + $0x1e8] sm:$0xff] }
  0x49   :  { %v528_v4 = vld [vmem:[#allocation10 + $0x178] sm:$0xff]  ;;  %s1347_s20 = sld [smem:[#allocation8 + $0x1]]  ;;  %1023 = vmatpush3.msra.mxu0 %v496_v3  ;;  %v527_v8 = vld [vmem:[#allocation10 + $0x170] sm:$0xff]  ;;  %v494_v11 = vld [vmem:[#allocation10 + $0x68] sm:$0xff] }
  0x4a   :  { %1061 = vmatpush3.msra.mxu1 %v528_v4  ;;  %1024 = vmatprep.subr.mxu0 %v511_v5  ;;  %v526_v12 = vld [vmem:[#allocation10 + $0x168] sm:$0xff]  ;;  %v509_v13 = vld [vmem:[#allocation10 + $0xe0] sm:$0xff]  ;;  %v508_v21 = vld [vmem:[#allocation10 + $0xd8] sm:$0xff]  ;;  %s1388_s26 = sld [smem:[#allocation2 + $0x19]] }
  0x4b   :  { %1062 = vmatprep.subr.mxu1 %v543_v6  ;;  %1025 = vmatpush3.msra.mxu0 %v495_v7  ;;  %v541_v14 = vld [vmem:[#allocation10 + $0x1e0] sm:$0xff]  ;;  %v540_v22 = vld [vmem:[#allocation10 + $0x1d8] sm:$0xff]  ;;  %v98_v24 = vld [vmem:[%s1973_s0 + $0x8] sm:$0xff]  ;;  %s1390_s27 = sld [smem:[#allocation2 + $0x24]] }
  0x4c   :  { %1063 = vmatpush3.msra.mxu1 %v527_v8  ;;  %v100_v15 = vstv %s1338_s16  ;;  %v107_v16 = vld [vmem:[%s1974_s1] sm:$0xff]  ;;  %1026 = vmatprep.subr.mxu0 %v510_v9  ;;  %v492_v25 = vld [vmem:[#allocation10 + $0x58] sm:$0xff]  ;;  %v507_v30 = vld [vmem:[#allocation10 + $0xd0] sm:$0xff]  ;;  %s1392_s28 = sld [smem:[#allocation2 + $0x25]] }
  0x4d   :  { %1064 = vmatprep.subr.mxu1 %v542_v10  ;;  %v493_v17 = vld [vmem:[#allocation10 + $0x60] sm:$0xff]  ;;  %v101_v19 = vmul.f32 %v100_v15, %v97_v2  ;;  %v104_v20 = vstv %s1340_s17  ;;  %1027 = vmatpush3.msra.mxu0 %v494_v11  ;;  %v524_v29 = vld [vmem:[#allocation10 + $0x158] sm:$0xff]  ;;  %v539_v31 = vld [vmem:[#allocation10 + $0x1d0] sm:$0xff]  ;;  %v102_v33 = vmul.f32 %v100_v15, %v98_v24  ;;  %s1394_s29 = sld [smem:[#allocation2 + $0x1b]] }
  0x4e   :  { %v525_v18 = vld [vmem:[#allocation10 + $0x160] sm:$0xff]  ;;  %1065 = vmatpush3.msra.mxu1 %v526_v12  ;;  %v110_v23 = vstv %s1345_s6  ;;  %1028 = vmatprep.subr.mxu0 %v509_v13  ;;  %v491_v34 = vld [vmem:[#allocation10 + $0x50] sm:$0xff]  ;;  %v108_v36 = vld [vmem:[%s1974_s1 + $0x8] sm:$0xff]  ;;  %s1386_s1 = sld [smem:[#allocation2 + $0x18]] }
  0x4f   :  { %1066 = vmatprep.subr.mxu1 %v541_v14  ;;  %v1358_v26 = vadd.f32 %v104_v20, %v101_v19  ;;  %v111_v27 = vmul.f32 %v110_v23, %v107_v16  ;;  %v114_v28 = vstv %s1347_s20  ;;  %1029 = vmatpush3.msra.mxu0 %v493_v17  ;;  %v523_v35 = vld [vmem:[#allocation10 + $0x150] sm:$0xff]  ;;  %v506_v37 = vld [vmem:[#allocation10 + $0xc8] sm:$0xff]  ;;  %v1372_v41 = vadd.f32 %v104_v20, %v102_v33  ;;  %v505_v43 = vld [vmem:[#allocation10 + $0xc0] sm:$0xff]  ;;  %s1396_s4 = sld [smem:[#allocation2 + $0x27]] }
  0x50   :  { %1067 = vmatpush3.msra.mxu1 %v525_v18  ;;  %1030 = vmatprep.subr.mxu0 %v508_v21  ;;  %v538_v38 = vld [vmem:[#allocation10 + $0x1c8] sm:$0xff]  ;;  %v112_v42 = vmul.f32 %v110_v23, %v108_v36  ;;  %v537_v44 = vld [vmem:[#allocation10 + $0x1c0] sm:$0xff]  ;;  %v504_v47 = vld [vmem:[#allocation10 + $0xb8] sm:$0xff]  ;;  %2039 = sst [smem:[#allocation16_spill]] %s1388_s26  ;;  %v117_v18 = vlaneseq  ;;  %v2013_v19 = vstv %s1388_s26 }
  0x51   :  { %1068 = vmatprep.subr.mxu1 %v540_v22  ;;  %120 = vrot.lane.b32.xlu0 %v1358_v26, %s1266_s23  ;;  %v1363_v32 = vadd.f32 %v114_v28, %v111_v27  ;;  %v490_v39 = vld [vmem:[#allocation10 + $0x48] sm:$0xff]  ;;  %v489_v45 = vld [vmem:[#allocation10 + $0x40] sm:$0xff]  ;;  %v536_v48 = vld [vmem:[#allocation10 + $0x1b8] sm:$0xff]  ;;  %2040 = sst [smem:[#allocation17_spill]] %s1390_s27  ;;  %v2018_v23 = vstv %s1390_s27 }
  0x52   :  { %1031 = vmatpush3.msra.mxu0 %v492_v25  ;;  %1069 = vmatpush3.msra.mxu1 %v524_v29  ;;  %v522_v40 = vld [vmem:[#allocation10 + $0x148] sm:$0xff]  ;;  %v521_v46 = vld [vmem:[#allocation10 + $0x140] sm:$0xff]  ;;  %v1378_v49 = vadd.f32 %v114_v28, %v112_v42  ;;  %v488_v50 = vld [vmem:[#allocation10 + $0x38] sm:$0xff]  ;;  %2041 = sst [smem:[#allocation18_spill]] %s1392_s28  ;;  %v2012_v20 = vstv %s1392_s28  ;;  %v1466_v21 = vand.u32 127, %v117_v18  ;;  %v1476_v25 = vmul.f32 %v2013_v19, %v1358_v26 }
  0x53   :  { %1032 = vmatprep.subr.mxu0 %v507_v30  ;;  %133 = vrot.lane.b32.xlu1 %v1363_v32, %s1266_s23  ;;  %v520_v51 = vld [vmem:[#allocation10 + $0x138] sm:$0xff]  ;;  %v503_v52 = vld [vmem:[#allocation10 + $0xb0] sm:$0xff]  ;;  %v502_v56 = vld [vmem:[#allocation10 + $0xa8] sm:$0xff]  ;;  %s1398_s5 = sld [smem:[#allocation2 + $0x1a]]  ;;  %v1481_v27 = vmul.f32 %v2012_v20, %v1358_v26  ;;  %v2027_v28 = vstv %s1394_s29 }
  0x54   :  { %1070 = vmatprep.subr.mxu1 %v539_v31  ;;  %1033 = vmatpush3.msra.mxu0 %v491_v34  ;;  %v535_v53 = vld [vmem:[#allocation10 + $0x1b0] sm:$0xff]  ;;  %v534_v57 = vld [vmem:[#allocation10 + $0x1a8] sm:$0xff]  ;;  %v501_v60 = vld [vmem:[#allocation10 + $0xa0] sm:$0xff]  ;;  %2038 = sst [smem:[#allocation15_spill]] %s1386_s1  ;;  %v2019_v22 = vstv %s1386_s1  ;;  %vm119_vm0 = vcmp.eq.s32.totalorder %v1466_v21, 0  ;;  %vm126_vm1 = vcmp.eq.s32.totalorder %v1466_v21, 31 }
  0x55   :  { %1071 = vmatpush3.msra.mxu1 %v523_v35  ;;  %127 = vrot.lane.b32.xlu0 %v1358_v26, %s1267_s25  ;;  %v487_v54 = vld [vmem:[#allocation10 + $0x30] sm:$0xff]  ;;  %v486_v58 = vld [vmem:[#allocation10 + $0x28] sm:$0xff]  ;;  %v533_v61 = vld [vmem:[#allocation10 + $0x1a0] sm:$0xff]  ;;  %s1400_s30 = sld [smem:[#allocation2 + $0x26]]  ;;  %v2029_v30 = vstv %s1396_s4 }
  0x56   :  { %1034 = vmatprep.subr.mxu0 %v506_v37  ;;  %1072 = vmatprep.subr.mxu1 %v538_v38  ;;  %v519_v55 = vld [vmem:[#allocation10 + $0x130] sm:$0xff]  ;;  %v518_v59 = vld [vmem:[#allocation10 + $0x128] sm:$0xff]  ;;  %v485_v62 = vld [vmem:[#allocation10 + $0x20] sm:$0xff]  ;;  %s1402_s11 = sld [smem:[#allocation2 + $0x6]] }
  0x57   :  { %1035 = vmatpush3.msra.mxu0 %v490_v39  ;;  %139 = vrot.lane.b32.xlu1 %v1363_v32, %s1267_s25  ;;  %v517_v63 = vld [vmem:[#allocation10 + $0x120] sm:$0xff]  ;;  %v500_v0 = vld [vmem:[#allocation10 + $0x98] sm:$0xff]  ;;  %v499_v4 = vld [vmem:[#allocation10 + $0x90] sm:$0xff]  ;;  %s1404_s12 = sld [smem:[#allocation2 + $0x7]] }
  0x58   :  { %1073 = vmatpush3.msra.mxu1 %v522_v40  ;;  %1036 = vmatprep.subr.mxu0 %v505_v43  ;;  %v532_v1 = vld [vmem:[#allocation10 + $0x198] sm:$0xff]  ;;  %v531_v5 = vld [vmem:[#allocation10 + $0x190] sm:$0xff]  ;;  %v498_v8 = vld [vmem:[#allocation10 + $0x88] sm:$0xff]  ;;  %s1406_s13 = sld [smem:[#allocation2 + $0x8]] }
  0x59   :  { %1074 = vmatprep.subr.mxu1 %v537_v44  ;;  %122 = vrot.lane.b32.xlu0 %v1372_v41, %s1266_s23  ;;  %v484_v2 = vld [vmem:[#allocation10 + $0x18] sm:$0xff]  ;;  %v483_v6 = vld [vmem:[#allocation10 + $0x10] sm:$0xff]  ;;  %v530_v9 = vld [vmem:[#allocation10 + $0x188] sm:$0xff]  ;;  %2042 = sst [smem:[#allocation19_spill]] %s1398_s5  ;;  %v2032_v31 = vstv %s1398_s5 }
  0x5a   :  { %1037 = vmatpush3.msra.mxu0 %v489_v45  ;;  %1075 = vmatpush3.msra.mxu1 %v521_v46  ;;  %v516_v3 = vld [vmem:[#allocation10 + $0x118] sm:$0xff]  ;;  %v515_v7 = vld [vmem:[#allocation10 + $0x110] sm:$0xff]  ;;  %v482_v10 = vld [vmem:[#allocation10 + $0x8] sm:$0xff]  ;;  %s1408_s14 = sld [smem:[#allocation2 + $0x9]] }
  0x5b   :  { %1038 = vmatprep.subr.mxu0 %v504_v47  ;;  %129 = vrot.lane.b32.xlu1 %v1372_v41, %s1267_s25  ;;  %v514_v11 = vld [vmem:[#allocation10 + $0x108] sm:$0xff]  ;;  %v497_v12 = vld [vmem:[#allocation10 + $0x80] sm:$0xff]  ;;  %v576_v16 = vld [vmem:[#allocation10 + $0x2f8] sm:$0xff]  ;;  %2043 = sst [smem:[#allocation20_spill]] %s1400_s30  ;;  %v2033_v33 = vstv %s1400_s30 }
  0x5c   :  { %1076 = vmatprep.subr.mxu1 %v536_v48  ;;  %1039 = vmatpush3.msra.mxu0 %v488_v50  ;;  %v529_v13 = vld [vmem:[#allocation10 + $0x180] sm:$0xff]  ;;  %v608_v17 = vld [vmem:[#allocation10 + $0x3f8] sm:$0xff]  ;;  %s1410_s15 = sld [smem:[#allocation2 + $0xa]]  ;;  %v188_v34 = vstv %s1402_s11 }
  0x5d   :  { %1077 = vmatpush3.msra.mxu1 %v520_v51  ;;  %135 = vrot.lane.b32.xlu0 %v1378_v49, %s1266_s23  ;;  %v481_v14 = vld [vmem:[#allocation10] sm:$0xff]  ;;  %s1412_s16 = sld [smem:[#allocation2 + $0xb]]  ;;  %v194_v24 = vstv %s1404_s12 }
  0x5e   :  { %1040 = vmatprep.subr.mxu0 %v503_v52  ;;  %1078 = vmatprep.subr.mxu1 %v535_v53  ;;  %v513_v15 = vld [vmem:[#allocation10 + $0x100] sm:$0xff]  ;;  %2044 = sst [smem:[#allocation21_spill]] %s1406_s13  ;;  %v1494_v35 = vmul.f32 %v194_v24, %v1358_v26  ;;  %v1497_v36 = vmul.f32 %v194_v24, %v1372_v41  ;;  %v200_v37 = vstv %s1406_s13 }
  0x5f   :  { %1041 = vmatpush3.msra.mxu0 %v487_v54  ;;  %141 = vrot.lane.b32.xlu1 %v1378_v49, %s1267_s25  ;;  %s1414_s17 = sld [smem:[#allocation5 + $0x1]] }
  0x60   :  { %1079 = vmatpush3.msra.mxu1 %v519_v55  ;;  %1042 = vmatprep.subr.mxu0 %v502_v56  ;;  %2045 = sst [smem:[#allocation22_spill]] %s1408_s14  ;;  %v206_v39 = vstv %s1408_s14 }
  0x61   :  { %1080 = vmatprep.subr.mxu1 %v534_v57  ;;  %1043 = vmatpush3.msra.mxu0 %v486_v58  ;;  %s1416_s18 = sld [smem:[#allocation2 + $0x12]] }
  0x62   :  { %1081 = vmatpush3.msra.mxu1 %v518_v59  ;;  %1044 = vmatprep.subr.mxu0 %v501_v60  ;;  %s1418_s19 = sld [smem:[#allocation2 + $0x13]]  ;;  %v212_v29 = vstv %s1410_s15 }
  0x63   :  { %1082 = vmatprep.subr.mxu1 %v533_v61  ;;  %1045 = vmatpush3.msra.mxu0 %v485_v62  ;;  %2046 = sst [smem:[#allocation23_spill]] %s1412_s16  ;;  %v1505_v40 = vmul.f32 %v212_v29, %v1363_v32  ;;  %v1508_v42 = vmul.f32 %v212_v29, %v1378_v49  ;;  %v218_v44 = vstv %s1412_s16 }
  0x64   :  { %1083 = vmatpush3.msra.mxu1 %v517_v63  ;;  %1046 = vmatprep.subr.mxu0 %v500_v0  ;;  %s1420_s6 = sld [smem:[#allocation2 + $0x14]] }
  0x65   :  { %1084 = vmatprep.subr.mxu1 %v532_v1  ;;  %1047 = vmatpush3.msra.mxu0 %v484_v2  ;;  %2047 = sst [smem:[#allocation24_spill]] %s1414_s17  ;;  %v224_v45 = vstv %s1414_s17 }
  0x66   :  { %1085 = vmatpush3.msra.mxu1 %v516_v3  ;;  %1048 = vmatprep.subr.mxu0 %v499_v4  ;;  %s1422_s20 = sld [smem:[#allocation2 + $0x15]] }
  0x67   :  { %1086 = vmatprep.subr.mxu1 %v531_v5  ;;  %1049 = vmatpush3.msra.mxu0 %v483_v6  ;;  %s1424_s21 = sld [smem:[#allocation2 + $0x16]]  ;;  %v272_v46 = vstv %s1416_s18 }
  0x68   :  { %1087 = vmatpush3.msra.mxu1 %v515_v7  ;;  %1050 = vmatprep.subr.mxu0 %v498_v8  ;;  %s1426_s3 = sld [smem:[#allocation2 + $0x17]]  ;;  %v278_v38 = vstv %s1418_s19 }
  0x69   :  { %1088 = vmatprep.subr.mxu1 %v530_v9  ;;  %1051 = vmatpush3.msra.mxu0 %v482_v10  ;;  %s1428_s2 = sld [smem:[#allocation5 + $0x3]]  ;;  %v1521_v48 = vmul.f32 %v278_v38, %v1358_v26  ;;  %v1524_v50 = vmul.f32 %v278_v38, %v1372_v41 }
  0x6a   :  { %1089 = vmatpush3.msra.mxu1 %v514_v11  ;;  %1052 = vmatprep.subr.mxu0 %v497_v12  ;;  %2048 = sst [smem:[#allocation25_spill]] %s1420_s6  ;;  %v284_v51 = vstv %s1420_s6 }
  0x6b   :  { %1090 = vmatprep.subr.mxu1 %v529_v13  ;;  %1053 = vmatpush3.msra.mxu0 %v481_v14  ;;  %s1430_s22 = sld [smem:[#allocation2]] }
  0x6c   :  { %1091 = vmatpush3.msra.mxu1 %v513_v15  ;;  %1098 = vmatprep.subr.mxu0 %v576_v16  ;;  %2049 = sst [smem:[#allocation26_spill]] %s1422_s20  ;;  %v290_v52 = vstv %s1422_s20 }
  0x6d   :  { %1136 = vmatprep.subr.mxu1 %v608_v17  ;;  %s1432_s23 = sld [smem:[#allocation2 + $0x1]]  ;;  %v296_v43 = vstv %s1424_s21 }
  0x6e   :  { %s1434_s0 = sld [smem:[#allocation2 + $0x2]]  ;;  %v1531_v53 = vmul.f32 %v296_v43, %v1363_v32  ;;  %v1534_v54 = vmul.f32 %v296_v43, %v1378_v49  ;;  %v302_v55 = vstv %s1426_s3 }
  0x6f   :  { %2050 = sst [smem:[#allocation27_spill]] %s1428_s2 }
  0x70   :  { %s1436_s24 = sld [smem:[#allocation2 + $0x3]] }
  0x71   :  { %2051 = sst [smem:[#allocation28_spill]] %s1430_s22 }
  0x72   :  { %s1438_s25 = sld [smem:[#allocation2 + $0x4]] }
  0x73   :  { %s1440_s10 = sld [smem:[#allocation2 + $0x5]]  ;;  %v152_v47 = vstv %s1432_s23 }
  0x74   :  { %2052 = sst [smem:[#allocation29_spill]] %s1434_s0  ;;  %v1543_v59 = vmul.f32 %v152_v47, %v1358_v26  ;;  %v1552_v0 = vmul.f32 %v152_v47, %v1372_v41 }
  0x75   :  { %s1442_s9 = sld [smem:[#allocation5]] }
  0x76   :  { %2053 = sst [smem:[#allocation30_spill]] %s1436_s24 }
  0x77   :  { %s1444_s8 = sld [smem:[#allocation2 + $0xc]] }
  0x78   :  { %s1446_s7 = sld [smem:[#allocation2 + $0xd]]  ;;  %v170_v56 = vstv %s1438_s25 }
  0x79   :  { %s1448_s22 = sld [smem:[#allocation2 + $0xe]]  ;;  %v1558_v1 = vmul.f32 %v170_v56, %v1363_v32  ;;  %v176_v2 = vstv %s1440_s10  ;;  %v1563_v4 = vmul.f32 %v170_v56, %v1378_v49 }
  0x7a   :  { %s1450_s2 = sld [smem:[#allocation2 + $0xf]] }
  0x7b   :  { %2054 = sst [smem:[#allocation31_spill]] %s1442_s9 }
  0x7c   :  { %s1452_s24 = sld [smem:[#allocation2 + $0x10]] }
  0x7d   :  { %2055 = sst [smem:[#allocation32_spill]] %s1444_s8 }
  0x7e   :  { %s1454_s0 = sld [smem:[#allocation2 + $0x11]]  ;;  %v236_v60 = vstv %s1446_s7 }
  0x7f   :  { %2056 = sst [smem:[#allocation33_spill]] %s1448_s22  ;;  %v1567_v6 = vmul.f32 %v236_v60, %v1358_v26  ;;  %v1576_v11 = vmul.f32 %v236_v60, %v1372_v41 }
  0x80   :  { %2057 = sst [smem:[#allocation34_spill]] %s1450_s2 }
  0x81   :  { %s1456_s9 = sld [smem:[#allocation5 + $0x2]] }
  0x82   :  { %s1458_s8 = sld [smem:[#allocation2 + $0x1e]]  ;;  %v254_v63 = vstv %s1452_s24 }
  0x83   :  { %s1462_s22 = sld [smem:[#allocation2 + $0x1f]]  ;;  %v1573_v10 = vmul.f32 %v254_v63, %v1363_v32  ;;  %v1582_v15 = vmul.f32 %v254_v63, %v1378_v49 }
  0x84   :  { %s1464_s2 = sld [smem:[#allocation2 + $0x20]] }
  0x85   :  { %s1491_s12 = sld [smem:[#allocation2 + $0x23]] }
  0x86   :  { %s1501_s15 = sld [smem:[#allocation2 + $0x2a]] }
  0x87   :  { %2058 = sst [smem:[#allocation35_spill]] %s1456_s9 }
  0x88   :  { %s1471_s9 = sld [smem:[#allocation2 + $0x21]]  ;;  %v2028_v17 = vstv %s1458_s8 }
  0x89   :  { %s1511_s28 = sld [smem:[#allocation2 + $0x2b]]  ;;  %v362_v8 = vstv %s1462_s22 }
  0x8a   :  { %2059 = sst [smem:[#allocation36_spill]] %s1464_s2  ;;  %v1587_v18 = vmul.f32 %v362_v8, %v1358_v26  ;;  %v1607_v14 = vmul.f32 %v362_v8, %v1372_v41 }
  0x8b   :  { %s1485_s2 = sld [smem:[#allocation2 + $0x22]] }
  0x8c   :  { %s2061_s30 = sld [smem:[#allocation28_spill]] }
  0x8d   :  { %s1517_s19 = sld [smem:[#allocation2 + $0x2c]] }
  0x8e   :  { %s2062_s5 = sld [smem:[#allocation29_spill]] }
  0x8f   :  { %s2063_s21 = sld [smem:[#allocation30_spill]]  ;;  %v2015_v16 = vstv %s1511_s28 }
  0x90   :  { %s1528_s17 = sld [smem:[#allocation2 + $0x2e]]  ;;  %v1602_v63 = vmul.f32 %v2015_v16, %v1358_v26 }
  0x91   :  { %s2065_s23 = sld [smem:[#allocation31_spill]]  ;;  %v2014_v12 = vstv %s1485_s2 }
  0x92   :  { %s1538_s16 = sld [smem:[#allocation2 + $0x1c]]  ;;  %v2022_v58 = vstv %s2061_s30  ;;  %v1595_v43 = vmul.f32 %v2014_v12, %v1363_v32 }
  0x93   :  { %s2067_s14 = sld [smem:[#allocation32_spill]] }
  0x94   :  { %s2068_s6 = sld [smem:[#allocation33_spill]]  ;;  %v2031_v61 = vstv %s2062_s5 }
  0x95   :  { %s2069_s20 = sld [smem:[#allocation34_spill]]  ;;  %v164_v62 = vstv %s2063_s21 }
  0x96   :  { %2064 = sst [smem:[#allocation28_spill]] %s1528_s17  ;;  %v2016_v29 = vstv %s1528_s17 }
  0x97   :  { %s1546_s13 = sld [smem:[#allocation2 + $0x28]]  ;;  %v1618_v38 = vmul.f32 %v2016_v29, %v1363_v32 }
  0x98   :  { %2066 = sst [smem:[#allocation29_spill]] %s1538_s16  ;;  %v2024_v20 = vstv %s1538_s16 }
  0x99   :  { %s2071_s25 = sld [smem:[#allocation35_spill]]  ;;  %v2030_v5 = vstv %s2067_s14 }
  0x9a   :  { %s1554_s26 = sld [smem:[#allocation2 + $0x2d]] }
  0x9b   :  { %s2072_s7 = sld [smem:[#allocation36_spill]] }
  0x9c   :  { %s2077_s17 = sld [smem:[#allocation19_spill]] }
  0x9d   :  { %2070 = sst [smem:[#allocation30_spill]] %s1546_s13  ;;  %v2026_v19 = vstv %s1546_s13 }
  0x9e   :  { %s2078_s16 = sld [smem:[#allocation20_spill]] }
  0x9f   :  { %s2081_s18 = sld [smem:[#allocation27_spill]] }
  0xa0   :  { %s1800_s1 = sld [smem:[#allocation2 + $0x2f]] }
  0xa1   :  { %s1814_s27 = sld [smem:[#allocation5 + $0x5]] }
  0xa2   :  { %s1842_s10 = sld [smem:[#allocation5 + $0x7]] }
  0xa3   :  { %s2111_s13 = sld [smem:[#allocation28_spill]] }
  0xc3   :  { %v121_v60 = vpop.permute.xlu0 %120 }
  0xc4   :  { %v1611_v12 = vsel %vm119_vm0, 0.0, %v121_v60 }
  0xc5   :  { %v315_v26 = vmul.f32 %v2019_v22, %v1611_v12  ;;  %v399_v8 = vmul.f32 %v2018_v23, %v1611_v12  ;;  %v134_v16 = vpop.permute.xlu1 %133  ;;  %v189_v60 = vmul.f32 %v188_v34, %v1611_v12  ;;  %v273_v56 = vmul.f32 %v272_v46, %v1611_v12 }
  0xc6   :  { %v1634_v29 = vsel %vm119_vm0, 0.0, %v134_v16  ;;  %v147_v47 = vmul.f32 %v2022_v58, %v1611_v12  ;;  %v1642_v23 = vmul.f32 %v2024_v20, %v1363_v32  ;;  %v1647_v22 = vmul.f32 %v2026_v19, %v1363_v32 }
  0xc7   :  { %v323_v24 = vadd.f32 %v1476_v25, %v315_v26  ;;  %v1651_v13 = vadd.f32 %v1481_v27, %v399_v8  ;;  %v128_v16 = vpop.permute.xlu0 %127  ;;  %v231_v58 = vmul.f32 %v2030_v5, %v1611_v12  ;;  %v1659_v20 = vmul.f32 %v2028_v17, %v1611_v12 }
  0xc8   :  { %v1664_v32 = vmul.f32 %v2027_v28, %v1634_v29  ;;  %v1669_v25 = vmul.f32 %v2029_v30, %v1634_v29  ;;  %v1673_v27 = vsel %vm126_vm1, 0.0, %v128_v16  ;;  %v197_v26 = vadd.f32 %v1494_v35, %v189_v60 }
  0xc9   :  { %v140_v8 = vpop.permute.xlu1 %139  ;;  %v201_v19 = vmul.f32 %v200_v37, %v1673_v27  ;;  %v207_v28 = vmul.f32 %v206_v39, %v1634_v29  ;;  %v281_v17 = vadd.f32 %v1521_v48, %v273_v56  ;;  %v285_v30 = vmul.f32 %v284_v51, %v1673_v27 }
  0xca   :  { %v1688_v16 = vsel %vm126_vm1, 0.0, %v140_v8  ;;  %v291_v35 = vmul.f32 %v290_v52, %v1634_v29  ;;  %v155_v60 = vadd.f32 %v1543_v59, %v147_v47  ;;  %v159_v5 = vmul.f32 %v2031_v61, %v1673_v27 }
  0xcb   :  { %v327_v48 = vmul.f32 %v2032_v31, %v1673_v27  ;;  %v1703_v56 = vmul.f32 %v2033_v33, %v1673_v27  ;;  %v123_v8 = vpop.permute.xlu0 %122  ;;  %v203_v3 = vadd.f32 %v201_v19, %v197_v26  ;;  %v219_v9 = vmul.f32 %v218_v44, %v1688_v16 }
  0xcc   :  { %v1710_v59 = vsel %vm119_vm0, 0.0, %v123_v8  ;;  %v287_v47 = vadd.f32 %v285_v30, %v281_v17  ;;  %v303_v61 = vmul.f32 %v302_v55, %v1688_v16  ;;  %v161_v31 = vadd.f32 %v159_v5, %v155_v60 }
  0xcd   :  { %v130_v7 = vpop.permute.xlu1 %129  ;;  %v190_v33 = vmul.f32 %v188_v34, %v1710_v59  ;;  %v209_v57 = vadd.f32 %v207_v28, %v203_v3  ;;  %v274_v19 = vmul.f32 %v272_v46, %v1710_v59  ;;  %v165_v26 = vmul.f32 %v164_v62, %v1634_v29 }
  0xce   :  { %v1726_v30 = vsel %vm126_vm1, 0.0, %v130_v7  ;;  %v293_v17 = vadd.f32 %v291_v35, %v287_v47  ;;  %v177_v5 = vmul.f32 %v176_v2, %v1688_v16  ;;  %v239_v60 = vadd.f32 %v1567_v6, %v231_v58 }
  0xcf   :  { %v136_v34 = vpop.permute.xlu0 %135  ;;  %v198_v28 = vadd.f32 %v1497_v36, %v190_v33  ;;  %v202_v46 = vmul.f32 %v200_v37, %v1726_v30  ;;  %v215_v3 = vadd.f32 %v1505_v40, %v209_v57  ;;  %v282_v8 = vadd.f32 %v1524_v50, %v274_v19 }
  0xd0   :  { %v1740_v7 = vsel %vm119_vm0, 0.0, %v136_v34  ;;  %v286_v58 = vmul.f32 %v284_v51, %v1726_v30  ;;  %v299_v6 = vadd.f32 %v1531_v53, %v293_v17  ;;  %v167_v33 = vadd.f32 %v165_v26, %v161_v31 }
  0xd1   :  { %v142_v36 = vpop.permute.xlu1 %141  ;;  %v204_v37 = vadd.f32 %v202_v46, %v198_v28  ;;  %v208_v40 = vmul.f32 %v206_v39, %v1740_v7  ;;  %v221_v50 = vadd.f32 %v219_v9, %v215_v3  ;;  %v292_v57 = vmul.f32 %v290_v52, %v1740_v7 }
  0xd2   :  { %v1754_v35 = vsel %vm126_vm1, 0.0, %v142_v36  ;;  %v288_v51 = vadd.f32 %v286_v58, %v282_v8  ;;  %v305_v47 = vadd.f32 %v303_v61, %v299_v6  ;;  %v173_v31 = vadd.f32 %v1558_v1, %v167_v33 }
  0xd3   :  { %v210_v53 = vadd.f32 %v208_v40, %v204_v37  ;;  %v220_v19 = vmul.f32 %v218_v44, %v1754_v35  ;;  %v225_v39 = vadd.f32 %v224_v45, %v221_v50  ;;  %v304_v52 = vmul.f32 %v302_v55, %v1754_v35 }
  0xd4   :  { %v294_v21 = vadd.f32 %v292_v57, %v288_v51  ;;  %v2082_v9 = vstv %s2081_s18  ;;  %v179_v17 = vadd.f32 %v177_v5, %v173_v31  ;;  %v2083_v61 = vstv %s2068_s6  ;;  %v560_v51 = vld [vmem:[#allocation10 + $0x278] sm:$0xff]  ;;  %v575_v31 = vld [vmem:[#allocation10 + $0x2f0] sm:$0xff]  ;;  %s2120_s6 = sld [smem:[#allocation17_spill]] }
  0xd5   :  { %v309_v26 = vadd.f32 %v2082_v9, %v305_v47  ;;  %v243_v34 = vmul.f32 %v2083_v61, %v1673_v27  ;;  %v1770_v1 = vadd.f32 %v327_v48, %v323_v24  ;;  %v216_v28 = vadd.f32 %v1508_v42, %v210_v53 }
  0xd6   :  { %v227_v44 = vmax.f32 %v225_v39, 0.0  ;;  %v2084_v46 = vstv %s2069_s20  ;;  %v300_v55 = vadd.f32 %v1534_v54, %v294_v21  ;;  %v2085_v58 = vstv %s2065_s23  ;;  %s2129_s20 = sld [smem:[#allocation37_spill]] }
  0xd7   :  { %v249_v3 = vmul.f32 %v2084_v46, %v1634_v29  ;;  %v311_v8 = vmax.f32 %v309_v26, 0.0  ;;  %v183_v6 = vadd.f32 %v2085_v58, %v179_v17  ;;  %v245_v5 = vadd.f32 %v243_v34, %v239_v60  ;;  %v574_v34 = vld [vmem:[#allocation10 + $0x2e8] sm:$0xff] }
  0xd8   :  { %v222_v33 = vadd.f32 %v220_v19, %v216_v28  ;;  %680 = vmatprep.mubr.f32.mxu0 %v227_v44  ;;  %v2086_v24 = vstv %s1454_s0  ;;  %v2087_v42 = vstv %s2061_s30  ;;  %v2088_v37 = vstv %s2062_s5  ;;  %s1857_s5 = sld [smem:[#allocation2 + $0x1d]] }
  0xd9   :  { %v261_v48 = vmul.f32 %v2086_v24, %v1688_v16  ;;  %v148_v36 = vmul.f32 %v2087_v42, %v1710_v59  ;;  %v160_v40 = vmul.f32 %v2088_v37, %v1726_v30  ;;  %v306_v50 = vadd.f32 %v304_v52, %v300_v55  ;;  %755 = vmatprep.mubr.f32.mxu1 %v311_v8  ;;  %s2101_s30 = sld [smem:[#allocation16_spill]] }
  0xda   :  { %v185_v54 = vmax.f32 %v183_v6, 0.0  ;;  %v251_v57 = vadd.f32 %v249_v3, %v245_v5  ;;  %v166_v60 = vmul.f32 %v164_v62, %v1740_v7  ;;  %v226_v47 = vadd.f32 %v224_v45, %v222_v33  ;;  %v559_v62 = vld [vmem:[#allocation10 + $0x270] sm:$0xff]  ;;  %v573_v6 = vld [vmem:[#allocation10 + $0x2e0] sm:$0xff]  ;;  %s2130_s0 = sld [smem:[#allocation38_spill]] }
  0xdb   :  { %v156_v53 = vadd.f32 %v1552_v0, %v148_v36  ;;  %v2089_v19 = vstv %s2067_s14  ;;  %v2090_v21 = vmov %v2083_v61  ;;  %v413_v9 = vadd.f32 %v1703_v56, %v1651_v13  ;;  %s2117_s14 = sld [smem:[#allocation29_spill]] }
  0xdc   :  { %v232_v39 = vmul.f32 %v2089_v19, %v1710_v59  ;;  %v244_v52 = vmul.f32 %v2090_v21, %v1726_v30  ;;  %v2091_v26 = vstv %s2081_s18  ;;  %681 = vmatmul.mubr.f32.vlgmr.msra.gmra.mxu0 %v185_v54  ;;  %v257_v45 = vadd.f32 %v1573_v10, %v251_v57  ;;  %v558_v10 = vld [vmem:[#allocation10 + $0x268] sm:$0xff]  ;;  %v592_v21 = vld [vmem:[#allocation10 + $0x378] sm:$0xff] }
  0xdd   :  { %v310_v17 = vadd.f32 %v2091_v26, %v306_v50  ;;  %v178_v0 = vmul.f32 %v176_v2, %v1754_v35  ;;  %v228_v61 = vmax.f32 %v226_v47, 0.0  ;;  %1099 = vmatpush3.msra.mxu0 %v560_v51  ;;  %v162_v28 = vadd.f32 %v160_v40, %v156_v53 }
  0xde   :  { %v240_v44 = vadd.f32 %v1576_v11, %v232_v39  ;;  %v2092_v13 = vmov %v2084_v46  ;;  %v263_v46 = vadd.f32 %v261_v48, %v257_v45  ;;  %1100 = vmatprep.subr.mxu0 %v575_v31  ;;  %v365_v2 = vadd.f32 %v1587_v18, %v1659_v20  ;;  %v557_v20 = vld [vmem:[#allocation10 + $0x260] sm:$0xff] }
  0xdf   :  { %v250_v56 = vmul.f32 %v2092_v13, %v1740_v7  ;;  %v2093_v3 = vstv %s2072_s7  ;;  %v2094_v8 = vstv %s1471_s9  ;;  %v312_v58 = vmax.f32 %v310_v17, 0.0  ;;  %1101 = vmatpush3.msra.mxu0 %v559_v62  ;;  %685 = vmatprep.mubr.f32.mxu0 %v228_v61  ;;  %v591_v61 = vld [vmem:[#allocation10 + $0x370] sm:$0xff] }
  0xe0   :  { %v369_v55 = vmul.f32 %v2093_v3, %v1673_v27  ;;  %v375_v11 = vmul.f32 %v2094_v8, %v1634_v29  ;;  %v168_v5 = vadd.f32 %v166_v60, %v162_v28  ;;  %v246_v33 = vadd.f32 %v244_v52, %v240_v44  ;;  %1102 = vmatprep.subr.mxu0 %v574_v34  ;;  %v572_v60 = vld [vmem:[#allocation10 + $0x2d8] sm:$0xff]  ;;  %v607_v52 = vld [vmem:[#allocation10 + $0x3f0] sm:$0xff]  ;;  %v570_v8 = vld [vmem:[#allocation10 + $0x2c8] sm:$0xff] }
  0xe1   :  { %v262_v48 = vmul.f32 %v2086_v24, %v1754_v35  ;;  %v2095_v42 = vstv %s2071_s25  ;;  %v2096_v37 = vstv %s1501_s15  ;;  %v2097_v50 = vstv %s1517_s19  ;;  %1103 = vmatpush3.msra.mxu0 %v558_v10  ;;  %v571_v28 = vld [vmem:[#allocation10 + $0x2d0] sm:$0xff]  ;;  %v605_v10 = vld [vmem:[#allocation10 + $0x3e0] sm:$0xff]  ;;  %s2132_s25 = sld [smem:[#allocation40_spill]] }
  0xe2   :  { %v267_v36 = vadd.f32 %v2095_v42, %v263_v46  ;;  %v371_v18 = vadd.f32 %v369_v55, %v365_v2  ;;  %v441_v40 = vmul.f32 %v2096_v37, %v1611_v12  ;;  %v453_v54 = vmul.f32 %v2097_v50, %v1673_v27  ;;  %1104 = vmatprep.subr.mxu0 %v573_v6 }
  0xe3   :  { %v174_v57 = vadd.f32 %v1563_v4, %v168_v5  ;;  %v252_v51 = vadd.f32 %v250_v56, %v246_v33  ;;  %v2098_v47 = vstv %s1491_s12  ;;  %v2099_v53 = vstv %s1554_s26  ;;  %1105 = vmatpush3.msra.mxu0 %v557_v20  ;;  %v554_v5 = vld [vmem:[#allocation10 + $0x248] sm:$0xff] }
  0xe4   :  { %v387_v31 = vmul.f32 %v2098_v47, %v1688_v16  ;;  %v459_v19 = vmul.f32 %v2099_v53, %v1634_v29  ;;  %v269_v39 = vmax.f32 %v267_v36, 0.0  ;;  %v377_v12 = vadd.f32 %v375_v11, %v371_v18  ;;  %v556_v29 = vld [vmem:[#allocation10 + $0x258] sm:$0xff]  ;;  %1106 = vmatprep.subr.mxu0 %v572_v60 }
  0xe5   :  { %v449_v27 = vadd.f32 %v1602_v63, %v441_v40  ;;  %v335_v4 = vadd.f32 %v1664_v32, %v1770_v1  ;;  %v180_v26 = vadd.f32 %v178_v0, %v174_v57  ;;  %v258_v17 = vadd.f32 %v1582_v15, %v252_v51  ;;  %v606_v1 = vld [vmem:[#allocation10 + $0x3e8] sm:$0xff]  ;;  %1107 = vmatpush3.msra.mxu0 %v556_v29  ;;  %v604_v40 = vld [vmem:[#allocation10 + $0x3d8] sm:$0xff] }
  0xe6   :  { %v470_v45 = vstv %s1800_s1  ;;  %v419_v62 = vadd.f32 %v1669_v25, %v413_v9  ;;  %756 = vmatmul.mubr.f32.vlgmr.msra.gmra.mxu1 %v269_v39  ;;  %v383_v34 = vadd.f32 %v1595_v43, %v377_v12  ;;  %v2100_v15 = vstv %s2065_s23  ;;  %v555_v25 = vld [vmem:[#allocation10 + $0x250] sm:$0xff]  ;;  %v590_v9 = vld [vmem:[#allocation10 + $0x368] sm:$0xff]  ;;  %1108 = vmatprep.subr.mxu0 %v571_v28 }
  0xe7   :  { %v455_v63 = vadd.f32 %v453_v54, %v449_v27  ;;  %v1852_v32 = vadd.f32 %v1642_v23, %v335_v4  ;;  %1137 = vmatpush3.msra.mxu1 %v592_v21  ;;  %760 = vmatprep.mubr.f32.mxu1 %v312_v58  ;;  %v184_v0 = vadd.f32 %v2100_v15, %v180_v26  ;;  %v392_v13 = vstv %s1814_s27  ;;  %v569_v54 = vld [vmem:[#allocation10 + $0x2c0] sm:$0xff]  ;;  %v603_v4 = vld [vmem:[#allocation10 + $0x3d0] sm:$0xff] }
  0xe8   :  { %v264_v44 = vadd.f32 %v262_v48, %v258_v17  ;;  %v1860_v43 = vadd.f32 %v1647_v22, %v419_v62  ;;  %1138 = vmatprep.subr.mxu1 %v607_v52  ;;  %v389_v23 = vadd.f32 %v387_v31, %v383_v34  ;;  %v471_v46 = vmul.f32 %v470_v45, %v1688_v16  ;;  %v553_v31 = vld [vmem:[#allocation10 + $0x240] sm:$0xff]  ;;  %v568_v52 = vld [vmem:[#allocation10 + $0x2b8] sm:$0xff] }
  0xe9   :  { %v461_v56 = vadd.f32 %v459_v19, %v455_v63  ;;  %1139 = vmatpush3.msra.mxu1 %v591_v61  ;;  %v186_v2 = vmax.f32 %v184_v0, 0.0  ;;  %v2102_v3 = vmov %v2095_v42  ;;  %v2103_v22 = vstv %s1458_s8  ;;  %1109 = vmatpush3.msra.mxu0 %v555_v25  ;;  %v589_v42 = vld [vmem:[#allocation10 + $0x360] sm:$0xff]  ;;  %s2106_s8 = sld [smem:[#allocation18_spill]]  ;;  %v587_v61 = vld [vmem:[#allocation10 + $0x350] sm:$0xff]  ;;  %v552_v25 = vld [vmem:[#allocation10 + $0x238] sm:$0xff] }
  0xea   :  { %v268_v55 = vadd.f32 %v2102_v3, %v264_v44  ;;  %v358_v11 = vmul.f32 %v2103_v22, %v1710_v59  ;;  %1140 = vmatprep.subr.mxu1 %v606_v1  ;;  %v393_v58 = vadd.f32 %v392_v13, %v389_v23  ;;  %v2104_v33 = vstv %s2101_s30  ;;  %1110 = vmatprep.subr.mxu0 %v570_v8  ;;  %v602_v44 = vld [vmem:[#allocation10 + $0x3c8] sm:$0xff]  ;;  %v567_v3 = vld [vmem:[#allocation10 + $0x2b0] sm:$0xff] }
  0xeb   :  { %v467_v6 = vadd.f32 %v1618_v38, %v461_v56  ;;  %v322_v24 = vmul.f32 %v2104_v33, %v1372_v41  ;;  %1141 = vmatpush3.msra.mxu1 %v590_v9  ;;  %686 = vmatmul.mubr.f32.gmra.mxu0 %v186_v2  ;;  %v476_v36 = vstv %s1842_s10  ;;  %v2105_v18 = vstv %s2072_s7  ;;  %v586_v2 = vld [vmem:[#allocation10 + $0x348] sm:$0xff] }
  0xec   :  { %v270_v48 = vmax.f32 %v268_v55, 0.0  ;;  %v366_v20 = vadd.f32 %v1607_v14, %v358_v11  ;;  %v370_v37 = vmul.f32 %v2105_v18, %v1726_v30  ;;  %1142 = vmatprep.subr.mxu1 %v605_v10  ;;  %v395_v38 = vmax.f32 %v393_v58, 0.0  ;;  %v588_v14 = vld [vmem:[#allocation10 + $0x358] sm:$0xff]  ;;  %1111 = vmatpush3.msra.mxu0 %v554_v5  ;;  %v551_v5 = vld [vmem:[#allocation10 + $0x230] sm:$0xff]  ;;  %v585_v18 = vld [vmem:[#allocation10 + $0x340] sm:$0xff] }
  0xed   :  { %v473_v50 = vadd.f32 %v471_v46, %v467_v6  ;;  %v2107_v57 = vstv %s1471_s9  ;;  %v2108_v60 = vstv %s1511_s28  ;;  %v2109_v19 = vstv %s1485_s2  ;;  %1143 = vmatpush3.msra.mxu1 %v589_v42  ;;  %s1895_s9 = sld [smem:[#allocation2 + $0x29]]  ;;  %1112 = vmatprep.subr.mxu0 %v569_v54  ;;  %v601_v6 = vld [vmem:[#allocation10 + $0x3c0] sm:$0xff] }
  0xee   :  { %v376_v51 = vmul.f32 %v2107_v57, %v1740_v7  ;;  %v448_v47 = vmul.f32 %v2108_v60, %v1372_v41  ;;  %761 = vmatmul.mubr.f32.gmra.mxu1 %v270_v48  ;;  %v372_v53 = vadd.f32 %v370_v37, %v366_v20  ;;  %v382_v39 = vmul.f32 %v2109_v19, %v1378_v49  ;;  %s2113_s28 = sld [smem:[#allocation15_spill]]  ;;  %v566_v37 = vld [vmem:[#allocation10 + $0x2a8] sm:$0xff] }
  0xef   :  { %v2110_v21 = vstv %s2106_s8  ;;  %830 = vmatprep.mubr.f32.mxu0 %v395_v38  ;;  %v477_v27 = vadd.f32 %v476_v36, %v473_v50  ;;  %v2112_v26 = vstv %s1501_s15  ;;  %v2114_v29 = vstv %s1517_s19  ;;  %1144 = vmatprep.subr.mxu1 %v604_v40  ;;  %s2131_s19 = sld [smem:[#allocation39_spill]] }
  0xf0   :  { %v406_v12 = vmul.f32 %v2110_v21, %v1372_v41  ;;  %v442_v17 = vmul.f32 %v2112_v26, %v1710_v59  ;;  %v454_v62 = vmul.f32 %v2114_v29, %v1726_v30  ;;  %v344_v41 = vstv %s1857_s5  ;;  %1145 = vmatpush3.msra.mxu1 %v588_v14  ;;  %1113 = vmatpush3.msra.mxu0 %v553_v31  ;;  %v584_v14 = vld [vmem:[#allocation10 + $0x338] sm:$0xff]  ;;  %v565_v31 = vld [vmem:[#allocation10 + $0x2a0] sm:$0xff]  ;;  %v583_v26 = vld [vmem:[#allocation10 + $0x330] sm:$0xff] }
  0xf1   :  { %v378_v34 = vadd.f32 %v376_v51, %v372_v53  ;;  %v2115_v63 = vstv %s1554_s26  ;;  %v2116_v1 = vstv %s2111_s13  ;;  %v479_v0 = vmax.f32 %v477_v27, 0.0  ;;  %1146 = vmatprep.subr.mxu1 %v603_v4  ;;  %1114 = vmatprep.subr.mxu0 %v568_v52  ;;  %s1916_s26 = sld [smem:[#allocation5 + $0x4]]  ;;  %v549_v21 = vld [vmem:[#allocation10 + $0x220] sm:$0xff] }
  0xf2   :  { %v460_v28 = vmul.f32 %v2115_v63, %v1740_v7  ;;  %v466_v15 = vmul.f32 %v2116_v1, %v1378_v49  ;;  %v450_v9 = vadd.f32 %v448_v47, %v442_v17  ;;  %v2119_v46 = vstv %s2077_s17  ;;  %1147 = vmatpush3.msra.mxu1 %v587_v61  ;;  %1115 = vmatpush3.msra.mxu0 %v552_v25  ;;  %v564_v17 = vld [vmem:[#allocation10 + $0x298] sm:$0xff]  ;;  %v563_v1 = vld [vmem:[#allocation10 + $0x290] sm:$0xff] }
  0xf3   :  { %v328_v10 = vmul.f32 %v2119_v46, %v1726_v30  ;;  %v384_v55 = vadd.f32 %v382_v39, %v378_v34  ;;  %v2121_v8 = vstv %s1394_s29  ;;  %v2122_v11 = vstv %s2117_s14  ;;  %905 = vmatprep.mubr.f32.mxu1 %v479_v0  ;;  %1148 = vmatprep.subr.mxu1 %v602_v44  ;;  %s2124_s29 = sld [smem:[#allocation30_spill]]  ;;  %v547_v25 = vld [vmem:[#allocation10 + $0x210] sm:$0xff]  ;;  %v596_v46 = vld [vmem:[#allocation10 + $0x398] sm:$0xff] }
  0xf4   :  { %v2118_v23 = vstv %s2113_s28  ;;  %v334_v22 = vmul.f32 %v2121_v8, %v1740_v7  ;;  %v340_v58 = vmul.f32 %v2122_v11, %v1378_v49  ;;  %v456_v33 = vadd.f32 %v454_v62, %v450_v9  ;;  %1149 = vmatpush3.msra.mxu1 %v586_v2  ;;  %1116 = vmatprep.subr.mxu0 %v567_v3  ;;  %v548_v62 = vld [vmem:[#allocation10 + $0x218] sm:$0xff]  ;;  %v595_v11 = vld [vmem:[#allocation10 + $0x390] sm:$0xff] }
  0xf5   :  { %v316_v56 = vmul.f32 %v2118_v23, %v1710_v59  ;;  %v2123_v42 = vstv %s2120_s6  ;;  %v345_v38 = vmul.f32 %v344_v41, %v1688_v16  ;;  %v2125_v40 = vstv %s2078_s16  ;;  %1150 = vmatprep.subr.mxu1 %v601_v6  ;;  %1117 = vmatpush3.msra.mxu0 %v551_v5  ;;  %v580_v3 = vld [vmem:[#allocation10 + $0x318] sm:$0xff] }
  0xf6   :  { %v400_v20 = vmul.f32 %v2123_v42, %v1710_v59  ;;  %v412_v50 = vmul.f32 %v2125_v40, %v1726_v30  ;;  %v2126_v54 = vstv %s1396_s4  ;;  %v550_v59 = vld [vmem:[#allocation10 + $0x228] sm:$0xff]  ;;  %v462_v51 = vadd.f32 %v460_v28, %v456_v33  ;;  %1151 = vmatpush3.msra.mxu1 %v585_v18  ;;  %1118 = vmatprep.subr.mxu0 %v566_v37  ;;  %s1943_s4 = sld [smem:[#allocation5 + $0x6]]  ;;  %v579_v33 = vld [vmem:[#allocation10 + $0x310] sm:$0xff]  ;;  %v593_v37 = vld [vmem:[#allocation10 + $0x380] sm:$0xff] }
  0xf7   :  { %v324_v48 = vadd.f32 %v322_v24, %v316_v56  ;;  %v418_v57 = vmul.f32 %v2126_v54, %v1740_v7  ;;  %v600_v24 = vld [vmem:[#allocation10 + $0x3b8] sm:$0xff]  ;;  %v2127_v53 = vstv %s1491_s12  ;;  %v599_v7 = vld [vmem:[#allocation10 + $0x3b0] sm:$0xff]  ;;  %v428_v27 = vstv %s1895_s9  ;;  %1119 = vmatpush3.msra.mxu0 %v550_v59  ;;  %v582_v28 = vld [vmem:[#allocation10 + $0x328] sm:$0xff] }
  0xf8   :  { %v408_v47 = vadd.f32 %v406_v12, %v400_v20  ;;  %v388_v19 = vmul.f32 %v2127_v53, %v1754_v35  ;;  %v468_v4 = vadd.f32 %v466_v15, %v462_v51  ;;  %1152 = vmatprep.subr.mxu1 %v600_v24  ;;  %v347_v29 = vadd.f32 %v345_v38, %v1852_v32  ;;  %v597_v32 = vld [vmem:[#allocation10 + $0x3a0] sm:$0xff]  ;;  %v562_v56 = vld [vmem:[#allocation10 + $0x288] sm:$0xff] }
  0xf9   :  { %v330_v60 = vadd.f32 %v328_v10, %v324_v48  ;;  %v2128_v30 = vstv %s2124_s29  ;;  %1153 = vmatpush3.msra.mxu1 %v584_v14  ;;  %1120 = vmatprep.subr.mxu0 %v565_v31  ;;  %v346_v34 = vmul.f32 %v344_v41, %v1754_v35  ;;  %v350_v15 = vstv %s1916_s26  ;;  %v581_v41 = vld [vmem:[#allocation10 + $0x320] sm:$0xff]  ;;  %v546_v10 = vld [vmem:[#allocation10 + $0x208] sm:$0xff] }
  0xfa   :  { %v424_v39 = vmul.f32 %v2128_v30, %v1378_v49  ;;  %v414_v52 = vadd.f32 %v412_v50, %v408_v47  ;;  %v598_v49 = vld [vmem:[#allocation10 + $0x3a8] sm:$0xff]  ;;  %1154 = vmatprep.subr.mxu1 %v599_v7  ;;  %1121 = vmatpush3.msra.mxu0 %v549_v21  ;;  %v429_v0 = vmul.f32 %v428_v27, %v1688_v16  ;;  %v577_v40 = vld [vmem:[#allocation10 + $0x300] sm:$0xff] }
  0xfb   :  { %v336_v12 = vadd.f32 %v334_v22, %v330_v60  ;;  %v390_v44 = vadd.f32 %v388_v19, %v384_v55  ;;  %1155 = vmatpush3.msra.mxu1 %v583_v26  ;;  %1122 = vmatprep.subr.mxu0 %v564_v17  ;;  %v472_v9 = vmul.f32 %v470_v45, %v1754_v35  ;;  %v561_v55 = vld [vmem:[#allocation10 + $0x280] sm:$0xff]  ;;  %v594_v48 = vld [vmem:[#allocation10 + $0x388] sm:$0xff] }
  0xfc   :  { %v420_v63 = vadd.f32 %v418_v57, %v414_v52  ;;  %1156 = vmatprep.subr.mxu1 %v598_v49  ;;  %1123 = vmatpush3.msra.mxu0 %v548_v62  ;;  %v351_v16 = vadd.f32 %v350_v15, %v347_v29  ;;  %v431_v8 = vadd.f32 %v429_v0, %v1860_v43  ;;  %v434_v6 = vstv %s1943_s4  ;;  %v578_v43 = vld [vmem:[#allocation10 + $0x308] sm:$0xff]  ;;  %v1010_v53 = vld [vmem:[%s2129_s20] ss:$0 sm:$0xff] }
  0xfd   :  { %v342_v61 = vadd.f32 %v340_v58, %v336_v12  ;;  %1157 = vmatpush3.msra.mxu1 %v582_v28  ;;  %1124 = vmatprep.subr.mxu0 %v563_v1  ;;  %v394_v45 = vadd.f32 %v392_v13, %v390_v44  ;;  %v430_v22 = vmul.f32 %v428_v27, %v1754_v35  ;;  %v545_v58 = vld [vmem:[#allocation10 + $0x200] sm:$0xff] }
  0xfe   :  { %v426_v23 = vadd.f32 %v424_v39, %v420_v63  ;;  %1158 = vmatprep.subr.mxu1 %v597_v32  ;;  %1125 = vmatpush3.msra.mxu0 %v547_v25  ;;  %v474_v5 = vadd.f32 %v472_v9, %v468_v4  ;;  %v353_v42 = vmax.f32 %v351_v16, 0.0  ;;  %v435_v13 = vadd.f32 %v434_v6, %v431_v8  ;;  %v1011_v0 = vld [vmem:[%s2130_s0] ss:$0 sm:$0xff] }
  0xff   :  { %v348_v2 = vadd.f32 %v346_v34, %v342_v61  ;;  %1159 = vmatpush3.msra.mxu1 %v581_v41  ;;  %1126 = vmatprep.subr.mxu0 %v562_v56  ;;  %v396_v35 = vmax.f32 %v394_v45, 0.0  ;;  %v1012_v56 = vld [vmem:[%s2131_s19] ss:$0 sm:$0xff] }
 0x100   :  { %1160 = vmatprep.subr.mxu1 %v596_v46  ;;  %1127 = vmatpush3.msra.mxu0 %v546_v10  ;;  %v432_v18 = vadd.f32 %v430_v22, %v426_v23  ;;  %v478_v38 = vadd.f32 %v476_v36, %v474_v5  ;;  %v437_v54 = vmax.f32 %v435_v13, 0.0 }
 0x101   :  { %1161 = vmatpush3.msra.mxu1 %v580_v3  ;;  %1128 = vmatprep.subr.mxu0 %v561_v55  ;;  %v352_v20 = vadd.f32 %v350_v15, %v348_v2 }
 0x102   :  { %1162 = vmatprep.subr.mxu1 %v595_v11  ;;  %1129 = vmatpush3.msra.mxu0 %v545_v58  ;;  %v436_v57 = vadd.f32 %v434_v6, %v432_v18  ;;  %v480_v24 = vmax.f32 %v478_v38, 0.0 }
 0x103   :  { %1163 = vmatpush3.msra.mxu1 %v579_v33  ;;  %831 = vmatmul.mubr.f32.vlgmr.msra.gmra.mxu0 %v353_v42  ;;  %v354_v50 = vmax.f32 %v352_v20, 0.0 }
 0x104   :  { %1164 = vmatprep.subr.mxu1 %v594_v48  ;;  %835 = vmatprep.mubr.f32.mxu0 %v396_v35  ;;  %v438_v59 = vmax.f32 %v436_v57, 0.0 }
 0x105   :  { %1165 = vmatpush3.msra.mxu1 %v578_v43 }
 0x106   :  { %1166 = vmatprep.subr.mxu1 %v593_v37 }
 0x107   :  { %1167 = vmatpush3.msra.mxu1 %v577_v40  ;;  %836 = vmatmul.mubr.f32.gmra.mxu0 %v354_v50 }
 0x108   :  { %906 = vmatmul.mubr.f32.vlgmr.msra.gmra.mxu1 %v437_v54 }
 0x109   :  { %910 = vmatprep.mubr.f32.mxu1 %v480_v24 }
 0x10c   :  { %911 = vmatmul.mubr.f32.gmra.mxu1 %v438_v59 }
 0x19c   :  { %v1054_v51 = vpop.f32.mrf.mxu0 }
 0x19e   :  { %v1055_v47 = vpop.f32.mrf.mxu0 }
 0x19f   :  { %v1056_v31 = vadd.f32 %v1055_v47, %v1054_v51 }
 0x1a1   :  { %v683_v39 = vadd.f32 %v1056_v31, %v1010_v53 }
 0x1a6   :  { %v1092_v60 = vpop.f32.mrf.mxu1 }
 0x1a8   :  { %v1093_v36 = vpop.f32.mrf.mxu1 }
 0x1a9   :  { %v1094_v4 = vadd.f32 %v1093_v36, %v1092_v60 }
 0x1ab   :  { %v1057_v14 = vpop.f32.mrf.mxu0  ;;  %v758_v26 = vadd.f32 %v1094_v4, %v683_v39 }
 0x1ad   :  { %v1058_v19 = vpop.f32.mrf.mxu0 }
 0x1ae   :  { %v1095_v30 = vpop.f32.mrf.mxu1  ;;  %v1059_v7 = vadd.f32 %v1058_v19, %v1057_v14 }
 0x1b0   :  { %v1096_v27 = vpop.f32.mrf.mxu1  ;;  %v688_v17 = vadd.f32 %v1059_v7, %v1010_v53 }
 0x1b1   :  { %v1097_v29 = vadd.f32 %v1096_v27, %v1095_v30 }
 0x1b3   :  { %v763_v1 = vadd.f32 %v1097_v29, %v688_v17 }
 0x1c3   :  { %v1130_v21 = vpop.f32.mrf.mxu0 }
 0x1c5   :  { %v1131_v12 = vpop.f32.mrf.mxu0 }
 0x1c6   :  { %v1132_v52 = vadd.f32 %v1131_v12, %v1130_v21 }
 0x1c7   :  { %v1133_v49 = vpop.f32.mrf.mxu0 }
 0x1c8   :  { %v1168_v62 = vpop.f32.mrf.mxu1  ;;  %v833_v61 = vadd.f32 %v1132_v52, %v758_v26 }
 0x1c9   :  { %v1134_v34 = vpop.f32.mrf.mxu0 }
 0x1ca   :  { %v1169_v63 = vpop.f32.mrf.mxu1  ;;  %v1135_v28 = vadd.f32 %v1134_v34, %v1133_v49 }
 0x1cb   :  { %v1170_v15 = vadd.f32 %v1169_v63, %v1168_v62 }
 0x1cc   :  { %v1171_v44 = vpop.f32.mrf.mxu1  ;;  %v838_v25 = vadd.f32 %v1135_v28, %v763_v1 }
 0x1cd   :  { %v908_v32 = vadd.f32 %v1170_v15, %v833_v61 }
 0x1ce   :  { %v1172_v9 = vpop.f32.mrf.mxu1 }
 0x1cf   :  { %v923_v23 = vmul.f32 %v1011_v0, %v908_v32  ;;  %v1173_v41 = vadd.f32 %v1172_v9, %v1171_v44 }
 0x1d1   :  { %v913_v46 = vadd.f32 %v1173_v41, %v838_v25  ;;  %v932_v10 = vadd.f32 %v1012_v56, %v923_v23 }
 0x1d3   :  { %v924_v16 = vmul.f32 %v1011_v0, %v913_v46  ;;  %v934_v3 = vmax.f32 %v932_v10, 0.0 }
 0x1d5   :  { %v933_v2 = vadd.f32 %v1012_v56, %v924_v16 }
 0x1d7   :  { %v935_v55 = vmax.f32 %v933_v2, 0.0 }
 0x1d9   :  { %v1020_v8 = vpack.c.bf16 %v935_v55, %v934_v3 }
 0x1db   :  { %1021 = vst [vmem:[%s2132_s25] sm:$0xff] %v1020_v8  }
 0x1dc   :  { %950 = vsyncpa [#allocation3], 1 }
 0x1dd   :  { %951 = vsyncpa [#allocation4], 1 }
 0x1de   :  { %952 = vsyncpa [#allocation6], 1 }
 0x1df   :  { %953 = vsyncpa [#allocation9], 1 }

</bundles_post_ra>
